<compile_context>
chip_gen: v7x
topology: tpu7x:2x2x1
jax: 0.10.0
libtpu: 0.0.40
codegen_flags: <defaults>
</compile_context>

<pallas_src>
import functools

import jax
import jax.numpy as jnp
import numpy as np
from jax import lax
from jax.experimental import pallas as pl
from jax.experimental.pallas import tpu as pltpu


def _vmem_limit_bytes():
    """Generation-aware VMEM budget: big on v5e/v6e (128 MiB), tight on v7x (64 MiB)."""
    cap = 64 << 20
    try:
        info = pltpu.get_tpu_info()
        cap = int(getattr(info, "vmem_capacity_bytes", cap))
    except Exception:
        pass
    return int(min(max(cap * 3 // 4, 32 << 20), 96 << 20))


# -----------------------------------------------------------------------------
# The single fused kernel: per-image block, all weights VMEM-resident.
# -----------------------------------------------------------------------------
def _shake_bottleneck_kernel(*refs, H, W, has_shortcut):
    if has_shortcut:
        (x_ref, w1_ref, sh1_ref, w2_ref, sh2_ref, w3_ref, sh3_ref,
         scw_ref, scsh_ref, o_ref, xp_ref, xsp_ref) = refs
    else:
        (x_ref, w1_ref, sh1_ref, w2_ref, sh2_ref, w3_ref, sh3_ref,
         o_ref, xp_ref) = refs

    rows = H * W
    in_ch = x_ref.shape[-1]
    C = w1_ref.shape[-1]                 # 2 * mid (both branches fused)
    out_ch = o_ref.shape[-1]
    bf16 = jnp.bfloat16

    # Zero only the 1-pixel halo of the padded scratch; the interior is fully
    # rewritten below (no full-tile memset, and correct under megacore sharding
    # because every read region is written in the same grid step).
    xp_ref[0:1, :, :] = jnp.zeros((1, W + 2, C), bf16)
    xp_ref[H + 1:H + 2, :, :] = jnp.zeros((1, W + 2, C), bf16)
    xp_ref[:, 0:1, :] = jnp.zeros((H + 2, 1, C), bf16)
    xp_ref[:, W + 1:W + 2, :] = jnp.zeros((H + 2, 1, C), bf16)

    x = x_ref[0]                                    # (H, W, in_ch)
    x_mm = x.reshape(rows, in_ch).astype(bf16)      # bf16 MXU operand

    # Stage 1: 1x1 conv of BOTH branches (BN scale folded) + shift + ReLU,
    # written straight into the padded scratch (mid activation never leaves VMEM).
    h1 = jnp.dot(x_mm, w1_ref[...], preferred_element_type=jnp.float32) + sh1_ref[...]
    h1 = jnp.maximum(h1, 0.0).astype(bf16)
    xp_ref[1:H + 1, 1:W + 1, :] = h1.reshape(H, W, C)

    # Stage 2: grouped 3x3 conv (2*cardinality groups, both branches) as 9 dense
    # block-diagonal matmuls: one full-width MXU call per tap.
    acc = None
    for ky in range(3):
        for kx in range(3):
            patch = xp_ref[ky:ky + H, kx:kx + W, :].reshape(rows, C)
            t = jnp.dot(patch, w2_ref[ky * 3 + kx],
                        preferred_element_type=jnp.float32)
            acc = t if acc is None else acc + t
    midv = jnp.maximum(acc + sh2_ref[...], 0.0).astype(bf16)

    # Stage 3: final 1x1 of both branches (0.5 shake alpha + BN scale folded).
    y = jnp.dot(midv, w3_ref[...], preferred_element_type=jnp.float32) + sh3_ref[...]

    # Residual path (fused; no h0 HBM round trip).
    if has_shortcut:
        # Shortcut = ReLU -> two 1x1 convs (normal / (+1,+1)-shifted input) ->
        # concat -> BN.  The concat is folded into zero-padded-column weights so
        # the result is a dense (rows, out_ch) add; the spatial shift is produced
        # in-kernel via a small padded scratch (last row / col stay zero).
        rx = jnp.maximum(x, 0.0)                    # x is bf16 in this case
        xsp_ref[H:H + 1, :, :] = jnp.zeros((1, W + 1, in_ch), bf16)
        xsp_ref[:, W:W + 1, :] = jnp.zeros((H + 1, 1, in_ch), bf16)
        xsp_ref[:H, :W, :] = rx
        rxs = xsp_ref[1:H + 1, 1:W + 1, :].reshape(rows, in_ch)
        h0 = (jnp.dot(rx.reshape(rows, in_ch), scw_ref[0],
                      preferred_element_type=jnp.float32)
              + jnp.dot(rxs, scw_ref[1], preferred_element_type=jnp.float32)
              + scsh_ref[...])
    else:
        h0 = x.reshape(rows, in_ch).astype(jnp.float32)   # identity residual

    o_ref[...] = (y + h0).reshape(1, H, W, out_ch).astype(o_ref.dtype)


def shake_bottleneck_forward(x_nchw, fused, *, stride=1):
    assert stride == 1, "stride > 1 not implemented"
    has_shortcut = "sc_w" in fused
    # bf16 activations (cast fused with the NCHW->NHWC transpose by XLA) halve the
    # dominant HBM read; x stays f32 only when it is also the identity residual.
    x_dtype = jnp.bfloat16 if has_shortcut else jnp.float32
    x = jnp.transpose(x_nchw, (0, 2, 3, 1)).astype(x_dtype)
    N, H, W, in_ch = x.shape
    C = fused["w1_all"].shape[1]
    out_ch = fused["w3_all"].shape[1]

    operands = [x,
                fused["w1_all"], fused["shift1"].reshape(1, C),
                fused["w2_bd"], fused["shift2"].reshape(1, C),
                fused["w3_all"], fused["shift3"].reshape(1, out_ch)]
    in_specs = [
        pl.BlockSpec((1, H, W, in_ch), lambda n: (n, 0, 0, 0)),
        pl.BlockSpec((in_ch, C), lambda n: (0, 0)),            # weights stay resident
        pl.BlockSpec((1, C), lambda n: (0, 0)),
        pl.BlockSpec((9, C, C), lambda n: (0, 0, 0)),
        pl.BlockSpec((1, C), lambda n: (0, 0)),
        pl.BlockSpec((C, out_ch), lambda n: (0, 0)),
        pl.BlockSpec((1, out_ch), lambda n: (0, 0)),
    ]
    scratch = [pltpu.VMEM((H + 2, W + 2, C), jnp.bfloat16)]    # padded mid activation
    if has_shortcut:
        operands += [fused["sc_w"], fused["sc_shift"].reshape(1, out_ch)]
        in_specs += [pl.BlockSpec((2, in_ch, out_ch), lambda n: (0, 0, 0)),
                     pl.BlockSpec((1, out_ch), lambda n: (0, 0))]
        scratch += [pltpu.VMEM((H + 1, W + 1, in_ch), jnp.bfloat16)]  # shifted ReLU(x)

    out = pl.pallas_call(
        functools.partial(_shake_bottleneck_kernel, H=H, W=W,
                          has_shortcut=has_shortcut),
        out_shape=jax.ShapeDtypeStruct((N, H, W, out_ch), jnp.float32),
        grid=(N,),
        in_specs=in_specs,
        out_specs=pl.BlockSpec((1, H, W, out_ch), lambda n: (n, 0, 0, 0)),
        scratch_shapes=scratch,
        compiler_params=pltpu.CompilerParams(
            dimension_semantics=("parallel",),
            vmem_limit_bytes=_vmem_limit_bytes()),
    )(*operands)
    return jnp.transpose(out, (0, 3, 1, 2))                     # NHWC -> NCHW


# -----------------------------------------------------------------------------
# Parameter setup (deterministic, synthetic) + fused/folded kernel weights
# -----------------------------------------------------------------------------
def init_params(key, in_ch, mid_ch, out_ch, card):
    def conv_w(k, cout, cin, kh=1, kw=1):
        fan_in = cin * kh * kw
        return jax.random.normal(k, (cout, cin, kh, kw), jnp.float32) * np.sqrt(2.0 / fan_in)

    def bn_fold(k, c):
        k1, k2, k3, k4 = jax.random.split(k, 4)
        gamma = 1.0 + 0.1 * jax.random.normal(k1, (c,), jnp.float32)
        beta = 0.1 * jax.random.normal(k2, (c,), jnp.float32)
        mean = 0.1 * jax.random.normal(k3, (c,), jnp.float32)
        var = 0.9 + 0.2 * jax.random.uniform(k4, (c,), jnp.float32)
        scale = gamma / jnp.sqrt(var + 1e-5)
        shift = beta - mean * scale
        return scale, shift

    def make_branch(k):
        kk = jax.random.split(k, 6)
        w1 = conv_w(kk[0], mid_ch, in_ch)
        s1, b1 = bn_fold(kk[1], mid_ch)
        w2 = conv_w(kk[2], mid_ch, mid_ch // card, 3, 3)
        s2, b2 = bn_fold(kk[3], mid_ch)
        w3 = conv_w(kk[4], out_ch, mid_ch)
        s3, b3 = bn_fold(kk[5], out_ch)
        return dict(
            w1=jnp.transpose(w1[:, :, 0, 0]), s1=s1, b1=b1,
            w2_torch=w2, s2=s2, b2=b2,
            w3=jnp.transpose(w3[:, :, 0, 0]), s3=s3, b3=b3,
        )

    k1, k2, k3 = jax.random.split(key, 3)
    params = dict(branch1=make_branch(k1), branch2=make_branch(k2))
    if in_ch != out_ch:
        kk = jax.random.split(k3, 3)
        sw1 = conv_w(kk[0], out_ch // 2, in_ch)
        sw2 = conv_w(kk[1], out_ch // 2, in_ch)
        s, b = bn_fold(kk[2], out_ch)
        params["shortcut"] = dict(
            w1=jnp.transpose(sw1[:, :, 0, 0]),
            w2=jnp.transpose(sw2[:, :, 0, 0]),
            s=s, b=b,
        )
    return params


def prepare_fused(params, card):
    """Fold BN scale (and 0.5 shake alpha) into bf16 weights; fuse both branches;
    build the per-tap block-diagonal grouped-conv weight."""
    b1p, b2p = params["branch1"], params["branch2"]

    def taps(p):
        w = p["w2_torch"]                                   # (mid, mid/card, 3, 3)
        cout, cin_pg, kh, kw = w.shape
        cout_pg = cout // card
        wg = w.reshape(card, cout_pg, cin_pg, kh, kw)
        wg = wg * p["s2"].reshape(card, cout_pg, 1, 1, 1)   # fold BN scale
        return jnp.transpose(wg, (3, 4, 0, 2, 1)).reshape(kh * kw, card, cin_pg, cout_pg)

    taps_all = jnp.concatenate([taps(b1p), taps(b2p)], axis=1)  # (9, 2*card, cpg, cout_pg)
    n_taps, groups, cpg, cout_pg = taps_all.shape
    C = groups * cout_pg
    # Block-diagonal per-tap weight: one dense (C, C) matmul per tap drives the full
    # MXU instead of `groups` tiny per-group matmuls (zero FLOPs are free — each tiny
    # matmul would have padded to the MXU tile anyway).
    w2_bd = jnp.zeros((n_taps, groups * cpg, C), jnp.float32)
    for g in range(groups):
        w2_bd = w2_bd.at[:, g * cpg:(g + 1) * cpg,
                         g * cout_pg:(g + 1) * cout_pg].set(taps_all[:, g])

    fused = dict(
        w1_all=jnp.concatenate([b1p["w1"] * b1p["s1"][None, :],
                                b2p["w1"] * b2p["s1"][None, :]],
                               axis=1).astype(jnp.bfloat16),
        shift1=jnp.concatenate([b1p["b1"], b2p["b1"]]),
        w2_bd=w2_bd.astype(jnp.bfloat16),
        shift2=jnp.concatenate([b1p["b2"], b2p["b2"]]),
        w3_all=jnp.concatenate([0.5 * b1p["w3"] * b1p["s3"][None, :],
                                0.5 * b2p["w3"] * b2p["s3"][None, :]],
                               axis=0).astype(jnp.bfloat16),
        shift3=0.5 * (b1p["b3"] + b2p["b3"]),
    )
    if "shortcut" in params:
        sc = params["shortcut"]
        in_ch, half = sc["w1"].shape
        out_ch = 2 * half
        # concat folded into zero-padded-column weights -> dense (rows, out_ch) output
        w1f = jnp.zeros((in_ch, out_ch), jnp.float32).at[:, :half].set(
            sc["w1"] * sc["s"][None, :half])
        w2f = jnp.zeros((in_ch, out_ch), jnp.float32).at[:, half:].set(
            sc["w2"] * sc["s"][None, half:])
        fused.update(sc_w=jnp.stack([w1f, w2f]).astype(jnp.bfloat16),
                     sc_shift=sc["b"])
    return fused


# -----------------------------------------------------------------------------
# Pure-JAX f32 reference (unfused, unfolded weights) for the correctness check
# -----------------------------------------------------------------------------
def _conv1x1_ref(x, w_io):
    return jnp.einsum("nhwc,cd->nhwd", x, w_io, precision=lax.Precision.HIGHEST)


def _branch_ref(x, p, card):
    h = _conv1x1_ref(x, p["w1"]) * p["s1"] + p["b1"]
    h = jnp.maximum(h, 0.0)
    w_hwio = jnp.transpose(p["w2_torch"], (2, 3, 1, 0))
    h = lax.conv_general_dilated(
        h, w_hwio, window_strides=(1, 1), padding=((1, 1), (1, 1)),
        dimension_numbers=("NHWC", "HWIO", "NHWC"),
        feature_group_count=card, precision=lax.Precision.HIGHEST)
    h = jnp.maximum(h * p["s2"] + p["b2"], 0.0)
    h = _conv1x1_ref(h, p["w3"]) * p["s3"] + p["b3"]
    return h


def _shortcut_ref(x, p):
    h = jnp.maximum(x, 0.0)
    h1 = _conv1x1_ref(h, p["w1"])
    hs = jnp.pad(h[:, 1:, 1:, :], ((0, 0), (0, 1), (0, 1), (0, 0)))
    h2 = _conv1x1_ref(hs, p["w2"])
    hc = jnp.concatenate([h1, h2], axis=-1)
    return hc * p["s"] + p["b"]


def reference_forward(x_nchw, params, *, cardinality):
    x = jnp.transpose(x_nchw, (0, 2, 3, 1)).astype(jnp.float32)
    in_ch = x.shape[-1]
    out_ch = params["branch1"]["w3"].shape[1]
    h1 = _branch_ref(x, params["branch1"], cardinality)
    h2 = _branch_ref(x, params["branch2"], cardinality)
    h0 = x if in_ch == out_ch else _shortcut_ref(x, params["shortcut"])
    out = 0.5 * h1 + 0.5 * h2 + h0
    return jnp.transpose(out, (0, 3, 1, 2))


if __name__ == "__main__":
    N, in_ch, mid_ch, out_ch, card, H, W = 2, 16, 16, 32, 2, 8, 8
    key = jax.random.PRNGKey(0)
    kx, kp = jax.random.split(key)
    x = jax.random.normal(kx, (N, in_ch, H, W), jnp.float32)      # NCHW like PyTorch
    params = init_params(kp, in_ch, mid_ch, out_ch, card)
    fused = prepare_fused(params, card)

    fwd = jax.jit(functools.partial(shake_bottleneck_forward, stride=1))
    out = jax.block_until_ready(fwd(x, fused))
    ref = jax.block_until_ready(reference_forward(x, params, cardinality=card))

    assert out.shape == (N, out_ch, H, W), out.shape
    # tolerance accounts for bf16 MXU operands vs the f32 HIGHEST-precision reference
    np.testing.assert_allclose(np.asarray(out), np.asarray(ref), rtol=5e-2, atol=1e-1)
    print("KERNEL_OK")
</pallas_src>

<mosaic_0001>
module attributes {stable_mosaic.version = 11 : i64} {
  func.func @_shake_bottleneck_kernel(%arg0: i32, %arg1: memref<1x8x8x16xbf16, #tpu.memory_space<vmem>>, %arg2: memref<16x32xbf16, #tpu.memory_space<vmem>>, %arg3: memref<1x32xf32, #tpu.memory_space<vmem>>, %arg4: memref<9x32x32xbf16, #tpu.memory_space<vmem>>, %arg5: memref<1x32xf32, #tpu.memory_space<vmem>>, %arg6: memref<32x32xbf16, #tpu.memory_space<vmem>>, %arg7: memref<1x32xf32, #tpu.memory_space<vmem>>, %arg8: memref<2x16x32xbf16, #tpu.memory_space<vmem>>, %arg9: memref<1x32xf32, #tpu.memory_space<vmem>>, %arg10: memref<1x8x8x32xf32, #tpu.memory_space<vmem>>, %arg11: memref<10x10x32xbf16, #tpu.memory_space<vmem>>, %arg12: memref<9x9x16xbf16, #tpu.memory_space<vmem>>) attributes {dimension_semantics = [#tpu.dimension_semantics<parallel>], iteration_bounds = array<i64: 2>, scalar_prefetch = 0 : i64, scratch_operands = 2 : i64, tpu.core_type = #tpu.core_type<tc>, window_params = [{transform_indices = @transform_0, window_bounds = array<i64: 1, 8, 8, 16>}, {pipeline_mode = #tpu.pipeline_mode<synchronous>, transform_indices = @transform_1, window_bounds = array<i64: 16, 32>}, {pipeline_mode = #tpu.pipeline_mode<synchronous>, transform_indices = @transform_2, window_bounds = array<i64: 1, 32>}, {pipeline_mode = #tpu.pipeline_mode<synchronous>, transform_indices = @transform_3, window_bounds = array<i64: 9, 32, 32>}, {pipeline_mode = #tpu.pipeline_mode<synchronous>, transform_indices = @transform_4, window_bounds = array<i64: 1, 32>}, {pipeline_mode = #tpu.pipeline_mode<synchronous>, transform_indices = @transform_5, window_bounds = array<i64: 32, 32>}, {pipeline_mode = #tpu.pipeline_mode<synchronous>, transform_indices = @transform_6, window_bounds = array<i64: 1, 32>}, {pipeline_mode = #tpu.pipeline_mode<synchronous>, transform_indices = @transform_7, window_bounds = array<i64: 2, 16, 32>}, {pipeline_mode = #tpu.pipeline_mode<synchronous>, transform_indices = @transform_8, window_bounds = array<i64: 1, 32>}, {transform_indices = @transform_9, window_bounds = array<i64: 1, 8, 8, 32>}]} {
    %cst = arith.constant 0.000000e+00 : bf16
    %0 = vector.broadcast %cst : bf16 to vector<1x10x32xbf16>
    %c0 = arith.constant 0 : index
    %c0_0 = arith.constant 0 : index
    %c0_1 = arith.constant 0 : index
    %1 = vector.load %arg11[%c0, %c0_0, %c0_1] : memref<10x10x32xbf16, #tpu.memory_space<vmem>>, vector<1x10x32xbf16>
    tpu.vector_store %arg11[%c0, %c0_0, %c0_1], %0 {strides = array<i32>} : memref<10x10x32xbf16, #tpu.memory_space<vmem>>, vector<1x10x32xbf16>,
    %cst_2 = arith.constant 0.000000e+00 : bf16
    %2 = vector.broadcast %cst_2 : bf16 to vector<1x10x32xbf16>
    %c9 = arith.constant 9 : index
    %c0_3 = arith.constant 0 : index
    %c0_4 = arith.constant 0 : index
    %3 = vector.load %arg11[%c9, %c0_3, %c0_4] : memref<10x10x32xbf16, #tpu.memory_space<vmem>>, vector<1x10x32xbf16>
    tpu.vector_store %arg11[%c9, %c0_3, %c0_4], %2 {strides = array<i32>} : memref<10x10x32xbf16, #tpu.memory_space<vmem>>, vector<1x10x32xbf16>,
    %cst_5 = arith.constant 0.000000e+00 : bf16
    %4 = vector.broadcast %cst_5 : bf16 to vector<10x1x32xbf16>
    %c0_6 = arith.constant 0 : index
    %c0_7 = arith.constant 0 : index
    %c0_8 = arith.constant 0 : index
    %5 = vector.load %arg11[%c0_6, %c0_7, %c0_8] : memref<10x10x32xbf16, #tpu.memory_space<vmem>>, vector<10x1x32xbf16>
    tpu.vector_store %arg11[%c0_6, %c0_7, %c0_8], %4 {strides = array<i32>} : memref<10x10x32xbf16, #tpu.memory_space<vmem>>, vector<10x1x32xbf16>,
    %cst_9 = arith.constant 0.000000e+00 : bf16
    %6 = vector.broadcast %cst_9 : bf16 to vector<10x1x32xbf16>
    %c0_10 = arith.constant 0 : index
    %c9_11 = arith.constant 9 : index
    %c0_12 = arith.constant 0 : index
    %7 = vector.load %arg11[%c0_10, %c9_11, %c0_12] : memref<10x10x32xbf16, #tpu.memory_space<vmem>>, vector<10x1x32xbf16>
    tpu.vector_store %arg11[%c0_10, %c9_11, %c0_12], %6 {strides = array<i32>} : memref<10x10x32xbf16, #tpu.memory_space<vmem>>, vector<10x1x32xbf16>,
    %c0_13 = arith.constant 0 : index
    %c0_14 = arith.constant 0 : index
    %c0_15 = arith.constant 0 : index
    %c0_16 = arith.constant 0 : index
    %8 = vector.load %arg1[%c0_13, %c0_14, %c0_15, %c0_16] : memref<1x8x8x16xbf16, #tpu.memory_space<vmem>>, vector<1x8x8x16xbf16>
    %9 = vector.shape_cast %8 : vector<1x8x8x16xbf16> to vector<8x8x16xbf16>
    %10 = vector.shape_cast %9 : vector<8x8x16xbf16> to vector<64x16xbf16>
    %c0_17 = arith.constant 0 : index
    %c0_18 = arith.constant 0 : index
    %11 = vector.load %arg2[%c0_17, %c0_18] : memref<16x32xbf16, #tpu.memory_space<vmem>>, vector<16x32xbf16>
    %cst_19 = arith.constant dense<0.000000e+00> : vector<64x32xf32>
    %12 = tpu.matmul %10, %11, %cst_19 {dimension_numbers = #tpu.dot_dimension_numbers<[1], [0], [0], [1], [0, 0, 1, 1], [], []>} : vector<64x16xbf16>, vector<16x32xbf16>, vector<64x32xf32> -> vector<64x32xf32>
    %c0_20 = arith.constant 0 : index
    %c0_21 = arith.constant 0 : index
    %13 = vector.load %arg3[%c0_20, %c0_21] : memref<1x32xf32, #tpu.memory_space<vmem>>, vector<1x32xf32>
    %14 = vector.broadcast %13 : vector<1x32xf32> to vector<64x32xf32>
    %15 = arith.addf %12, %14 : vector<64x32xf32>
    %cst_22 = arith.constant 0.000000e+00 : f32
    %16 = vector.broadcast %cst_22 : f32 to vector<64x32xf32>
    %17 = arith.maximumf %15, %16 : vector<64x32xf32>
    %18 = arith.truncf %17 : vector<64x32xf32> to vector<64x32xbf16>
    %19 = vector.shape_cast %18 : vector<64x32xbf16> to vector<8x8x32xbf16>
    %c1 = arith.constant 1 : index
    %c1_23 = arith.constant 1 : index
    %c0_24 = arith.constant 0 : index
    %20 = vector.load %arg11[%c1, %c1_23, %c0_24] : memref<10x10x32xbf16, #tpu.memory_space<vmem>>, vector<8x8x32xbf16>
    tpu.vector_store %arg11[%c1, %c1_23, %c0_24], %19 {strides = array<i32>} : memref<10x10x32xbf16, #tpu.memory_space<vmem>>, vector<8x8x32xbf16>,
    %c0_25 = arith.constant 0 : index
    %c0_26 = arith.constant 0 : index
    %c0_27 = arith.constant 0 : index
    %21 = vector.load %arg11[%c0_25, %c0_26, %c0_27] : memref<10x10x32xbf16, #tpu.memory_space<vmem>>, vector<8x8x32xbf16>
    %22 = vector.shape_cast %21 : vector<8x8x32xbf16> to vector<64x32xbf16>
    %c0_28 = arith.constant 0 : index
    %c0_29 = arith.constant 0 : index
    %c0_30 = arith.constant 0 : index
    %23 = vector.load %arg4[%c0_28, %c0_29, %c0_30] : memref<9x32x32xbf16, #tpu.memory_space<vmem>>, vector<1x32x32xbf16>
    %24 = vector.shape_cast %23 : vector<1x32x32xbf16> to vector<32x32xbf16>
    %cst_31 = arith.constant dense<0.000000e+00> : vector<64x32xf32>
    %25 = tpu.matmul %22, %24, %cst_31 {dimension_numbers = #tpu.dot_dimension_numbers<[1], [0], [0], [1], [0, 0, 1, 1], [], []>} : vector<64x32xbf16>, vector<32x32xbf16>, vector<64x32xf32> -> vector<64x32xf32>
    %c0_32 = arith.constant 0 : index
    %c1_33 = arith.constant 1 : index
    %c0_34 = arith.constant 0 : index
    %26 = vector.load %arg11[%c0_32, %c1_33, %c0_34] : memref<10x10x32xbf16, #tpu.memory_space<vmem>>, vector<8x8x32xbf16>
    %27 = vector.shape_cast %26 : vector<8x8x32xbf16> to vector<64x32xbf16>
    %c1_35 = arith.constant 1 : index
    %c0_36 = arith.constant 0 : index
    %c0_37 = arith.constant 0 : index
    %28 = vector.load %arg4[%c1_35, %c0_36, %c0_37] : memref<9x32x32xbf16, #tpu.memory_space<vmem>>, vector<1x32x32xbf16>
    %29 = vector.shape_cast %28 : vector<1x32x32xbf16> to vector<32x32xbf16>
    %cst_38 = arith.constant dense<0.000000e+00> : vector<64x32xf32>
    %30 = tpu.matmul %27, %29, %cst_38 {dimension_numbers = #tpu.dot_dimension_numbers<[1], [0], [0], [1], [0, 0, 1, 1], [], []>} : vector<64x32xbf16>, vector<32x32xbf16>, vector<64x32xf32> -> vector<64x32xf32>
    %31 = arith.addf %25, %30 : vector<64x32xf32>
    %c0_39 = arith.constant 0 : index
    %c2 = arith.constant 2 : index
    %c0_40 = arith.constant 0 : index
    %32 = vector.load %arg11[%c0_39, %c2, %c0_40] : memref<10x10x32xbf16, #tpu.memory_space<vmem>>, vector<8x8x32xbf16>
    %33 = vector.shape_cast %32 : vector<8x8x32xbf16> to vector<64x32xbf16>
    %c2_41 = arith.constant 2 : index
    %c0_42 = arith.constant 0 : index
    %c0_43 = arith.constant 0 : index
    %34 = vector.load %arg4[%c2_41, %c0_42, %c0_43] : memref<9x32x32xbf16, #tpu.memory_space<vmem>>, vector<1x32x32xbf16>
    %35 = vector.shape_cast %34 : vector<1x32x32xbf16> to vector<32x32xbf16>
    %cst_44 = arith.constant dense<0.000000e+00> : vector<64x32xf32>
    %36 = tpu.matmul %33, %35, %cst_44 {dimension_numbers = #tpu.dot_dimension_numbers<[1], [0], [0], [1], [0, 0, 1, 1], [], []>} : vector<64x32xbf16>, vector<32x32xbf16>, vector<64x32xf32> -> vector<64x32xf32>
    %37 = arith.addf %31, %36 : vector<64x32xf32>
    %c1_45 = arith.constant 1 : index
    %c0_46 = arith.constant 0 : index
    %c0_47 = arith.constant 0 : index
    %38 = vector.load %arg11[%c1_45, %c0_46, %c0_47] : memref<10x10x32xbf16, #tpu.memory_space<vmem>>, vector<8x8x32xbf16>
    %39 = vector.shape_cast %38 : vector<8x8x32xbf16> to vector<64x32xbf16>
    %c3 = arith.constant 3 : index
    %c0_48 = arith.constant 0 : index
    %c0_49 = arith.constant 0 : index
    %40 = vector.load %arg4[%c3, %c0_48, %c0_49] : memref<9x32x32xbf16, #tpu.memory_space<vmem>>, vector<1x32x32xbf16>
    %41 = vector.shape_cast %40 : vector<1x32x32xbf16> to vector<32x32xbf16>
    %cst_50 = arith.constant dense<0.000000e+00> : vector<64x32xf32>
    %42 = tpu.matmul %39, %41, %cst_50 {dimension_numbers = #tpu.dot_dimension_numbers<[1], [0], [0], [1], [0, 0, 1, 1], [], []>} : vector<64x32xbf16>, vector<32x32xbf16>, vector<64x32xf32> -> vector<64x32xf32>
    %43 = arith.addf %37, %42 : vector<64x32xf32>
    %c1_51 = arith.constant 1 : index
    %c1_52 = arith.constant 1 : index
    %c0_53 = arith.constant 0 : index
    %44 = vector.load %arg11[%c1_51, %c1_52, %c0_53] : memref<10x10x32xbf16, #tpu.memory_space<vmem>>, vector<8x8x32xbf16>
    %45 = vector.shape_cast %44 : vector<8x8x32xbf16> to vector<64x32xbf16>
    %c4 = arith.constant 4 : index
    %c0_54 = arith.constant 0 : index
    %c0_55 = arith.constant 0 : index
    %46 = vector.load %arg4[%c4, %c0_54, %c0_55] : memref<9x32x32xbf16, #tpu.memory_space<vmem>>, vector<1x32x32xbf16>
    %47 = vector.shape_cast %46 : vector<1x32x32xbf16> to vector<32x32xbf16>
    %cst_56 = arith.constant dense<0.000000e+00> : vector<64x32xf32>
    %48 = tpu.matmul %45, %47, %cst_56 {dimension_numbers = #tpu.dot_dimension_numbers<[1], [0], [0], [1], [0, 0, 1, 1], [], []>} : vector<64x32xbf16>, vector<32x32xbf16>, vector<64x32xf32> -> vector<64x32xf32>
    %49 = arith.addf %43, %48 : vector<64x32xf32>
    %c1_57 = arith.constant 1 : index
    %c2_58 = arith.constant 2 : index
    %c0_59 = arith.constant 0 : index
    %50 = vector.load %arg11[%c1_57, %c2_58, %c0_59] : memref<10x10x32xbf16, #tpu.memory_space<vmem>>, vector<8x8x32xbf16>
    %51 = vector.shape_cast %50 : vector<8x8x32xbf16> to vector<64x32xbf16>
    %c5 = arith.constant 5 : index
    %c0_60 = arith.constant 0 : index
    %c0_61 = arith.constant 0 : index
    %52 = vector.load %arg4[%c5, %c0_60, %c0_61] : memref<9x32x32xbf16, #tpu.memory_space<vmem>>, vector<1x32x32xbf16>
    %53 = vector.shape_cast %52 : vector<1x32x32xbf16> to vector<32x32xbf16>
    %cst_62 = arith.constant dense<0.000000e+00> : vector<64x32xf32>
    %54 = tpu.matmul %51, %53, %cst_62 {dimension_numbers = #tpu.dot_dimension_numbers<[1], [0], [0], [1], [0, 0, 1, 1], [], []>} : vector<64x32xbf16>, vector<32x32xbf16>, vector<64x32xf32> -> vector<64x32xf32>
    %55 = arith.addf %49, %54 : vector<64x32xf32>
    %c2_63 = arith.constant 2 : index
    %c0_64 = arith.constant 0 : index
    %c0_65 = arith.constant 0 : index
    %56 = vector.load %arg11[%c2_63, %c0_64, %c0_65] : memref<10x10x32xbf16, #tpu.memory_space<vmem>>, vector<8x8x32xbf16>
    %57 = vector.shape_cast %56 : vector<8x8x32xbf16> to vector<64x32xbf16>
    %c6 = arith.constant 6 : index
    %c0_66 = arith.constant 0 : index
    %c0_67 = arith.constant 0 : index
    %58 = vector.load %arg4[%c6, %c0_66, %c0_67] : memref<9x32x32xbf16, #tpu.memory_space<vmem>>, vector<1x32x32xbf16>
    %59 = vector.shape_cast %58 : vector<1x32x32xbf16> to vector<32x32xbf16>
    %cst_68 = arith.constant dense<0.000000e+00> : vector<64x32xf32>
    %60 = tpu.matmul %57, %59, %cst_68 {dimension_numbers = #tpu.dot_dimension_numbers<[1], [0], [0], [1], [0, 0, 1, 1], [], []>} : vector<64x32xbf16>, vector<32x32xbf16>, vector<64x32xf32> -> vector<64x32xf32>
    %61 = arith.addf %55, %60 : vector<64x32xf32>
    %c2_69 = arith.constant 2 : index
    %c1_70 = arith.constant 1 : index
    %c0_71 = arith.constant 0 : index
    %62 = vector.load %arg11[%c2_69, %c1_70, %c0_71] : memref<10x10x32xbf16, #tpu.memory_space<vmem>>, vector<8x8x32xbf16>
    %63 = vector.shape_cast %62 : vector<8x8x32xbf16> to vector<64x32xbf16>
    %c7 = arith.constant 7 : index
    %c0_72 = arith.constant 0 : index
    %c0_73 = arith.constant 0 : index
    %64 = vector.load %arg4[%c7, %c0_72, %c0_73] : memref<9x32x32xbf16, #tpu.memory_space<vmem>>, vector<1x32x32xbf16>
    %65 = vector.shape_cast %64 : vector<1x32x32xbf16> to vector<32x32xbf16>
    %cst_74 = arith.constant dense<0.000000e+00> : vector<64x32xf32>
    %66 = tpu.matmul %63, %65, %cst_74 {dimension_numbers = #tpu.dot_dimension_numbers<[1], [0], [0], [1], [0, 0, 1, 1], [], []>} : vector<64x32xbf16>, vector<32x32xbf16>, vector<64x32xf32> -> vector<64x32xf32>
    %67 = arith.addf %61, %66 : vector<64x32xf32>
    %c2_75 = arith.constant 2 : index
    %c2_76 = arith.constant 2 : index
    %c0_77 = arith.constant 0 : index
    %68 = vector.load %arg11[%c2_75, %c2_76, %c0_77] : memref<10x10x32xbf16, #tpu.memory_space<vmem>>, vector<8x8x32xbf16>
    %69 = vector.shape_cast %68 : vector<8x8x32xbf16> to vector<64x32xbf16>
    %c8 = arith.constant 8 : index
    %c0_78 = arith.constant 0 : index
    %c0_79 = arith.constant 0 : index
    %70 = vector.load %arg4[%c8, %c0_78, %c0_79] : memref<9x32x32xbf16, #tpu.memory_space<vmem>>, vector<1x32x32xbf16>
    %71 = vector.shape_cast %70 : vector<1x32x32xbf16> to vector<32x32xbf16>
    %cst_80 = arith.constant dense<0.000000e+00> : vector<64x32xf32>
    %72 = tpu.matmul %69, %71, %cst_80 {dimension_numbers = #tpu.dot_dimension_numbers<[1], [0], [0], [1], [0, 0, 1, 1], [], []>} : vector<64x32xbf16>, vector<32x32xbf16>, vector<64x32xf32> -> vector<64x32xf32>
    %73 = arith.addf %67, %72 : vector<64x32xf32>
    %c0_81 = arith.constant 0 : index
    %c0_82 = arith.constant 0 : index
    %74 = vector.load %arg5[%c0_81, %c0_82] : memref<1x32xf32, #tpu.memory_space<vmem>>, vector<1x32xf32>
    %75 = vector.broadcast %74 : vector<1x32xf32> to vector<64x32xf32>
    %76 = arith.addf %73, %75 : vector<64x32xf32>
    %cst_83 = arith.constant 0.000000e+00 : f32
    %77 = vector.broadcast %cst_83 : f32 to vector<64x32xf32>
    %78 = arith.maximumf %76, %77 : vector<64x32xf32>
    %79 = arith.truncf %78 : vector<64x32xf32> to vector<64x32xbf16>
    %c0_84 = arith.constant 0 : index
    %c0_85 = arith.constant 0 : index
    %80 = vector.load %arg6[%c0_84, %c0_85] : memref<32x32xbf16, #tpu.memory_space<vmem>>, vector<32x32xbf16>
    %cst_86 = arith.constant dense<0.000000e+00> : vector<64x32xf32>
    %81 = tpu.matmul %79, %80, %cst_86 {dimension_numbers = #tpu.dot_dimension_numbers<[1], [0], [0], [1], [0, 0, 1, 1], [], []>} : vector<64x32xbf16>, vector<32x32xbf16>, vector<64x32xf32> -> vector<64x32xf32>
    %c0_87 = arith.constant 0 : index
    %c0_88 = arith.constant 0 : index
    %82 = vector.load %arg7[%c0_87, %c0_88] : memref<1x32xf32, #tpu.memory_space<vmem>>, vector<1x32xf32>
    %83 = vector.broadcast %82 : vector<1x32xf32> to vector<64x32xf32>
    %84 = arith.addf %81, %83 : vector<64x32xf32>
    %cst_89 = arith.constant 0.000000e+00 : bf16
    %85 = vector.broadcast %cst_89 : bf16 to vector<8x8x16xbf16>
    %86 = arith.maximumf %9, %85 : vector<8x8x16xbf16>
    %cst_90 = arith.constant 0.000000e+00 : bf16
    %87 = vector.broadcast %cst_90 : bf16 to vector<1x9x16xbf16>
    %c8_91 = arith.constant 8 : index
    %c0_92 = arith.constant 0 : index
    %c0_93 = arith.constant 0 : index
    %88 = vector.load %arg12[%c8_91, %c0_92, %c0_93] : memref<9x9x16xbf16, #tpu.memory_space<vmem>>, vector<1x9x16xbf16>
    tpu.vector_store %arg12[%c8_91, %c0_92, %c0_93], %87 {strides = array<i32>} : memref<9x9x16xbf16, #tpu.memory_space<vmem>>, vector<1x9x16xbf16>,
    %cst_94 = arith.constant 0.000000e+00 : bf16
    %89 = vector.broadcast %cst_94 : bf16 to vector<9x1x16xbf16>
    %c0_95 = arith.constant 0 : index
    %c8_96 = arith.constant 8 : index
    %c0_97 = arith.constant 0 : index
    %90 = vector.load %arg12[%c0_95, %c8_96, %c0_97] : memref<9x9x16xbf16, #tpu.memory_space<vmem>>, vector<9x1x16xbf16>
    tpu.vector_store %arg12[%c0_95, %c8_96, %c0_97], %89 {strides = array<i32>} : memref<9x9x16xbf16, #tpu.memory_space<vmem>>, vector<9x1x16xbf16>,
    %c0_98 = arith.constant 0 : index
    %c0_99 = arith.constant 0 : index
    %c0_100 = arith.constant 0 : index
    %91 = vector.load %arg12[%c0_98, %c0_99, %c0_100] : memref<9x9x16xbf16, #tpu.memory_space<vmem>>, vector<8x8x16xbf16>
    tpu.vector_store %arg12[%c0_98, %c0_99, %c0_100], %86 {strides = array<i32>} : memref<9x9x16xbf16, #tpu.memory_space<vmem>>, vector<8x8x16xbf16>,
    %c1_101 = arith.constant 1 : index
    %c1_102 = arith.constant 1 : index
    %c0_103 = arith.constant 0 : index
    %92 = vector.load %arg12[%c1_101, %c1_102, %c0_103] : memref<9x9x16xbf16, #tpu.memory_space<vmem>>, vector<8x8x16xbf16>
    %93 = vector.shape_cast %92 : vector<8x8x16xbf16> to vector<64x16xbf16>
    %94 = vector.shape_cast %86 : vector<8x8x16xbf16> to vector<64x16xbf16>
    %c0_104 = arith.constant 0 : index
    %c0_105 = arith.constant 0 : index
    %c0_106 = arith.constant 0 : index
    %95 = vector.load %arg8[%c0_104, %c0_105, %c0_106] : memref<2x16x32xbf16, #tpu.memory_space<vmem>>, vector<1x16x32xbf16>
    %96 = vector.shape_cast %95 : vector<1x16x32xbf16> to vector<16x32xbf16>
    %cst_107 = arith.constant dense<0.000000e+00> : vector<64x32xf32>
    %97 = tpu.matmul %94, %96, %cst_107 {dimension_numbers = #tpu.dot_dimension_numbers<[1], [0], [0], [1], [0, 0, 1, 1], [], []>} : vector<64x16xbf16>, vector<16x32xbf16>, vector<64x32xf32> -> vector<64x32xf32>
    %c1_108 = arith.constant 1 : index
    %c0_109 = arith.constant 0 : index
    %c0_110 = arith.constant 0 : index
    %98 = vector.load %arg8[%c1_108, %c0_109, %c0_110] : memref<2x16x32xbf16, #tpu.memory_space<vmem>>, vector<1x16x32xbf16>
    %99 = vector.shape_cast %98 : vector<1x16x32xbf16> to vector<16x32xbf16>
    %cst_111 = arith.constant dense<0.000000e+00> : vector<64x32xf32>
    %100 = tpu.matmul %93, %99, %cst_111 {dimension_numbers = #tpu.dot_dimension_numbers<[1], [0], [0], [1], [0, 0, 1, 1], [], []>} : vector<64x16xbf16>, vector<16x32xbf16>, vector<64x32xf32> -> vector<64x32xf32>
    %101 = arith.addf %97, %100 : vector<64x32xf32>
    %c0_112 = arith.constant 0 : index
    %c0_113 = arith.constant 0 : index
    %102 = vector.load %arg9[%c0_112, %c0_113] : memref<1x32xf32, #tpu.memory_space<vmem>>, vector<1x32xf32>
    %103 = vector.broadcast %102 : vector<1x32xf32> to vector<64x32xf32>
    %104 = arith.addf %101, %103 : vector<64x32xf32>
    %105 = arith.addf %84, %104 : vector<64x32xf32>
    %106 = vector.shape_cast %105 : vector<64x32xf32> to vector<1x8x8x32xf32>
    %c0_114 = arith.constant 0 : index
    %c0_115 = arith.constant 0 : index
    %c0_116 = arith.constant 0 : index
    %c0_117 = arith.constant 0 : index
    %107 = vector.load %arg10[%c0_114, %c0_115, %c0_116, %c0_117] : memref<1x8x8x32xf32, #tpu.memory_space<vmem>>, vector<1x8x8x32xf32>
    tpu.vector_store %arg10[%c0_114, %c0_115, %c0_116, %c0_117], %106 {strides = array<i32>} : memref<1x8x8x32xf32, #tpu.memory_space<vmem>>, vector<1x8x8x32xf32>,
    return
  }
  func.func @transform_0(%arg0: i32) -> (i32, i32, i32, i32) {
    %c0_i32 = arith.constant 0 : i32
    %c0_i32_0 = arith.constant 0 : i32
    %c0_i32_1 = arith.constant 0 : i32
    %c0_i32_2 = arith.constant 0 : i32
    return %arg0, %c0_i32, %c0_i32_0, %c0_i32_1 : i32, i32, i32, i32
  }
  func.func @transform_1(%arg0: i32) -> (i32, i32) {
    %c0_i32 = arith.constant 0 : i32
    %c0_i32_0 = arith.constant 0 : i32
    %c0_i32_1 = arith.constant 0 : i32
    return %c0_i32, %c0_i32_0 : i32, i32
  }
  func.func @transform_2(%arg0: i32) -> (i32, i32) {
    %c0_i32 = arith.constant 0 : i32
    %c0_i32_0 = arith.constant 0 : i32
    %c0_i32_1 = arith.constant 0 : i32
    return %c0_i32, %c0_i32_0 : i32, i32
  }
  func.func @transform_3(%arg0: i32) -> (i32, i32, i32) {
    %c0_i32 = arith.constant 0 : i32
    %c0_i32_0 = arith.constant 0 : i32
    %c0_i32_1 = arith.constant 0 : i32
    %c0_i32_2 = arith.constant 0 : i32
    return %c0_i32, %c0_i32_0, %c0_i32_1 : i32, i32, i32
  }
  func.func @transform_4(%arg0: i32) -> (i32, i32) {
    %c0_i32 = arith.constant 0 : i32
    %c0_i32_0 = arith.constant 0 : i32
    %c0_i32_1 = arith.constant 0 : i32
    return %c0_i32, %c0_i32_0 : i32, i32
  }
  func.func @transform_5(%arg0: i32) -> (i32, i32) {
    %c0_i32 = arith.constant 0 : i32
    %c0_i32_0 = arith.constant 0 : i32
    %c0_i32_1 = arith.constant 0 : i32
    return %c0_i32, %c0_i32_0 : i32, i32
  }
  func.func @transform_6(%arg0: i32) -> (i32, i32) {
    %c0_i32 = arith.constant 0 : i32
    %c0_i32_0 = arith.constant 0 : i32
    %c0_i32_1 = arith.constant 0 : i32
    return %c0_i32, %c0_i32_0 : i32, i32
  }
  func.func @transform_7(%arg0: i32) -> (i32, i32, i32) {
    %c0_i32 = arith.constant 0 : i32
    %c0_i32_0 = arith.constant 0 : i32
    %c0_i32_1 = arith.constant 0 : i32
    %c0_i32_2 = arith.constant 0 : i32
    return %c0_i32, %c0_i32_0, %c0_i32_1 : i32, i32, i32
  }
  func.func @transform_8(%arg0: i32) -> (i32, i32) {
    %c0_i32 = arith.constant 0 : i32
    %c0_i32_0 = arith.constant 0 : i32
    %c0_i32_1 = arith.constant 0 : i32
    return %c0_i32, %c0_i32_0 : i32, i32
  }
  func.func @transform_9(%arg0: i32) -> (i32, i32, i32, i32) {
    %c0_i32 = arith.constant 0 : i32
    %c0_i32_0 = arith.constant 0 : i32
    %c0_i32_1 = arith.constant 0 : i32
    %c0_i32_2 = arith.constant 0 : i32
    return %arg0, %c0_i32, %c0_i32_0, %c0_i32_1 : i32, i32, i32, i32
  }
}

</mosaic_0001>

<bundles_post_ra>
// kernel: shake_bottleneck_forward.1
= control target key start
LH: loop header
LB: loop body
LE: loop exit
PB: predicated region body
PF: predicated region fallthrough
CT: control target
= control target key end

     0   :  { %14 = vsyncpa [#allocation5], 0  ;;  %s4415_s0 = inlined_call_operand.vmem [shape: bf16[2,8,8,16], index: 0, kind: input, shape index: {}]   ;;  %s4416_s1 = inlined_call_operand.vmem [shape: bf16[16,32], index: 1, kind: input, shape index: {}]   ;;  %s4417_s2 = inlined_call_operand.vmem [shape: f32[1,32], index: 2, kind: input, shape index: {}]   ;;  %s4418_s3 = inlined_call_operand.vmem [shape: bf16[9,32,32], index: 3, kind: input, shape index: {}]   ;;  %s4419_s4 = inlined_call_operand.vmem [shape: f32[1,32], index: 4, kind: input, shape index: {}]   ;;  %s4420_s5 = inlined_call_operand.vmem [shape: bf16[32,32], index: 5, kind: input, shape index: {}]   ;;  %s4421_s6 = inlined_call_operand.vmem [shape: f32[1,32], index: 6, kind: input, shape index: {}]   ;;  %s4422_s7 = inlined_call_operand.vmem [shape: bf16[2,16,32], index: 7, kind: input, shape index: {}]   ;;  %s4423_s8 = inlined_call_operand.vmem [shape: f32[1,32], index: 8, kind: input, shape index: {}]   ;;  %s4424_s9 = inlined_call_operand.hbm [shape: f32[2,8,8,32], index: 9, kind: output, shape index: {}]  }
   0x1   :  { %16 = vsyncpa [#allocation5 + $0x1], 0  ;;  %s3653_s30 = smov 0   ;;  %s3655_s10 = smov 0  }
   0x2   :  { %s3657_s11 = smov 0   ;;  %s3659_s12 = smov 0  }
   0x3 LB: > { %s3674_s13 = sadd.s32 4294967295, %s3597_s12   ;;  %s2914_s14 = sadd.s32 4294967294, %s3597_s12   ;;  %s3597_s12 = sphi %s3659_s12, %s4442_s12   ;;  %s3593_s11 = sphi %s3657_s11, %s4441_s11   ;;  %s3589_s10 = sphi %s3655_s10, %s4440_s10   ;;  %s3585_s30 = sphi %s3653_s30, %s4439_s30  }
   0x4   : > { %s3678_s15 = sadd.s32 1, %s3597_s12   ;;  %s223_s16 = sadd.s32 1, %s3593_s11 }
   0x5   : > { %s220_s17 = ssub.s32 %s3597_s12, %s3678_s15  ;;  %p233_p0 = scmp.ne.s32.totalorder %s3593_s11, %s3589_s10 }
   0x6   : > { %p221_p1 = scmp.eq.s32.totalorder %s220_s17, 0  ;;  %p234_p2 = scmp.eq.s32.totalorder %s3674_s13, 1 }
   0x7   : > { %p239_p3 = scmp.ne.s32.totalorder %s3589_s10, %s3585_s30  ;;  %p240_p4 = scmp.eq.s32.totalorder %s2914_s14, 1 }
   0x8   : > { %s3689_s18 = scalar_select %p221_p1, %s3593_s11, %s223_s16  }
   0x9   : > { %p3691_p5 = por %p234_p2, %p233_p0  ;;  %p3695_p6 = por %p240_p4, %p239_p3 }
   0xa   : > { %p2917_p7 = scmp.ge.s32.totalorder %s3597_s12, 1  ;;  %p290_p8 = scmp.lt.s32.totalorder %s3597_s12, 3 }
   0xc   : > { %p291_p9 = pnand %p2917_p7, %p290_p8 }
   0xd   : > { %v3496_v0 = vld [vmem:[%s4416_s1] sm:$0xff] (!%p291_p9)   ;;  %p326_p10 = scmp.lt.s32.totalorder (!%p291_p9), %s3674_s13, 1  ;;  %vm2433_vm0 = vcmask (!%p291_p9), 125952   ;;  %vm332_vm1 = vcmask (!%p291_p9), 257024   ;;  %v351_v1 = vld [vmem:[#allocation2 + $0x18] sm:$0x1] (!%p291_p9) }
   0xe   : > { %294 = sbr.rel (%p291_p9) target bundleno = 871 (0x367), region = 56  ;;  %3204 = vmatprep.subr.bf16.mxu0 (!%p291_p9), %v3496_v0  ;;  %v3599_v2 = vmov (!%p291_p9), 0   ;;  %vm334_vm2 = vcmask (!%p291_p9), 253952   ;;  %vm340_vm3 = vsmask.f32 (!%p291_p9), 256  ;;  %vm447_vm7 = vcmask (!%p291_p9), 130048  }
   0xf   : > { %2434 = vst.msk [vmem:[#allocation3 + $0x40] sm:$0xf] (!%p291_p9), %vm2433_vm0, %v3599_v2  ;;  %vm372_vm4 = vsmask.f32 (!%p291_p9), 7938  ;;  %3205 = vmatpush3.bf16.msra.mxu0 (!%p291_p9), %v3496_v0  ;;  %vm3710_vm5 = vmand (!%p291_p9), %vm334_vm2, %vm340_vm3  ;;  %v383_v4 = vld [vmem:[#allocation2 + $0x1c] sm:$0x1] (!%p291_p9) }
  0x10   : > { %333 = vst.msk [vmem:[#allocation2] sm:$0xf] (!%p291_p9), %vm332_vm1, %v3599_v2  ;;  %337 = vst.msk [vmem:[#allocation2 + $0x48] sm:$0xf] (!%p291_p9), %vm332_vm1, %v3599_v2  ;;  %v352_v5 = vsel (!%p291_p9), %vm3710_vm5, 0, %v351_v1  ;;  %v3814_v6 = vld [vmem:[%s4418_s3 + $0x28] sm:$0xff] (!%p291_p9)  }
  0x11   : > { %335 = vst.msk [vmem:[#allocation2 + $0x4] sm:$0x1] (!%p291_p9), %vm334_vm2, %v3599_v2  ;;  %338 = vst.msk [vmem:[#allocation2 + $0x4c] sm:$0x1] (!%p291_p9), %vm334_vm2, %v3599_v2  ;;  %v345_v38 = vld [vmem:[#allocation2 + $0x8] sm:$0x1] (!%p291_p9) }
  0x12   : > { %vm3717_vm6 = vmand (!%p291_p9), %vm334_vm2, %vm372_vm4  ;;  %353 = vst [vmem:[#allocation2 + $0x18] sm:$0x1] (!%p291_p9), %v352_v5  ;;  %v377_v39 = vld [vmem:[#allocation2 + $0xc] sm:$0x1] (!%p291_p9)  ;;  %v346_v40 = vsel (!%p291_p9), %vm3710_vm5, 0, %v345_v38  ;;  %v3503_v5 = vld [vmem:[%s4418_s3 + $0x18] sm:$0xff] (!%p291_p9)  }
  0x13   : > { %v384_v7 = vsel (!%p291_p9), %vm3717_vm6, 0, %v383_v4  ;;  %v378_v41 = vsel (!%p291_p9), %vm3717_vm6, 0, %v377_v39  ;;  %v354_v42 = vld [vmem:[#allocation2 + $0x20] sm:$0x1] (!%p291_p9)  ;;  %v386_v43 = vld [vmem:[#allocation2 + $0x24] sm:$0x1] (!%p291_p9)  ;;  %vm3857_vm8 = vmand (!%p291_p9), %vm332_vm1, %vm372_vm4 }
  0x14   : > { %385 = vst [vmem:[#allocation2 + $0x1c] sm:$0x1] (!%p291_p9), %v384_v7  ;;  %347 = vst [vmem:[#allocation2 + $0x8] sm:$0x1] (!%p291_p9), %v346_v40  ;;  %v355_v44 = vsel (!%p291_p9), %vm3710_vm5, 0, %v354_v42  ;;  %v387_v45 = vsel (!%p291_p9), %vm3717_vm6, 0, %v386_v43 }
  0x15   : > { %s327_s23 = scalar_select %p326_p10, %s3674_s13, 1  ;;  %379 = vst [vmem:[#allocation2 + $0xc] sm:$0x1] %v378_v41  ;;  %v348_v46 = vld [vmem:[#allocation2 + $0x10] sm:$0x1]  ;;  %v3806_v4 = vld [vmem:[%s4418_s3 + $0x20] sm:$0xff]  }
  0x16   : > { %v380_v47 = vld [vmem:[#allocation2 + $0x14] sm:$0x1]  ;;  %356 = vst [vmem:[#allocation2 + $0x20] sm:$0x1] %v355_v44  ;;  %388 = vst [vmem:[#allocation2 + $0x24] sm:$0x1] %v387_v45  ;;  %3354 = vmatprep.subr.bf16.mxu1 %v3806_v4 }
  0x17   : > { %s3119_s24 = sshll.u32 %s327_s23, 5  ;;  %v342_v27 = vld [vmem:[#allocation2] sm:$0x1]  ;;  %v369_v28 = vld [vmem:[#allocation2 + $0x48] sm:$0x1]  ;;  %v349_v48 = vsel %vm3710_vm5, 0, %v348_v46  ;;  %3356 = vmatpush3.bf16.msra.mxu1 %v3806_v4 }
  0x18   : > { %s330_s27 = scalar_lea.vmem %s4415_s0, %s3119_s24  ;;  %v343_v31 = vsel %vm3710_vm5, 0, %v342_v27  ;;  %v370_v32 = vsel %vm3710_vm5, 0, %v369_v28  ;;  %v374_v33 = vld [vmem:[#allocation2 + $0x4] sm:$0x1]  ;;  %v401_v34 = vld [vmem:[#allocation2 + $0x4c] sm:$0x1]  ;;  %3355 = vmatprep.subr.bf16.mxu1 %v3814_v6 }
  0x19   : > { %v404_v8 = vld [vmem:[%s330_s27] sm:$0xf]  ;;  %v405_v9 = vld [vmem:[%s330_s27 + $0x4] sm:$0xf]  ;;  %v406_v10 = vld [vmem:[%s330_s27 + $0x8] sm:$0xf] }
  0x1a   : > { %v2922_v11 = vcombine.low %v404_v8, %v405_v9  ;;  %v3726_v12 = vmax.bf16 %v3599_v2, %v404_v8  ;;  %v3728_v13 = vmax.bf16 %v3599_v2, %v405_v9  ;;  %v407_v14 = vld [vmem:[%s330_s27 + $0xc] sm:$0xf]  ;;  %v3730_v15 = vmax.bf16 %v3599_v2, %v406_v10  ;;  %v408_v16 = vld [vmem:[%s330_s27 + $0x10] sm:$0xf]  ;;  %v409_v17 = vld [vmem:[%s330_s27 + $0x14] sm:$0xf] }
  0x1b   : > { %v2923_v18 = vcombine.low %v406_v10, %v407_v14  ;;  %v3732_v19 = vmax.bf16 %v3599_v2, %v407_v14  ;;  %v2924_v20 = vcombine.low %v408_v16, %v409_v17  ;;  %v3734_v21 = vmax.bf16 %v3599_v2, %v408_v16  ;;  %v410_v22 = vld [vmem:[%s330_s27 + $0x18] sm:$0xf]  ;;  %v411_v23 = vld [vmem:[%s330_s27 + $0x1c] sm:$0xf]  ;;  %344 = vst [vmem:[#allocation2] sm:$0x1] %v343_v31 }
  0x1c   : > { %3206 = vmatprep.mubr.msk.bf16.mxu0 %vm447_vm7, %v2922_v11  ;;  %2468 = vst.msk [vmem:[#allocation3 + $0x8] sm:$0xf] %vm2433_vm0, %v3728_v13  ;;  %v3104_v24 = vcombine.low %v3726_v12, %v3728_v13  ;;  %2469 = vst.msk [vmem:[#allocation3 + $0x10] sm:$0xf] %vm2433_vm0, %v3730_v15  ;;  %v3743_v25 = vmax.bf16 %v3599_v2, %v409_v17  ;;  %v3745_v26 = vmax.bf16 %v3599_v2, %v410_v22  ;;  %v363_v50 = vld [vmem:[#allocation2 + $0x38] sm:$0x1] }
  0x1d   : > { %3207 = vmatmul.mubr.msk.bf16.vlgmr.msra.gmra.mrb[0].mxu0 %vm447_vm7, %v2923_v18  ;;  %2470 = vst.msk [vmem:[#allocation3 + $0x18] sm:$0xf] %vm2433_vm0, %v3732_v19  ;;  %v3105_v29 = vcombine.low %v3730_v15, %v3732_v19  ;;  %2471 = vst.msk [vmem:[#allocation3 + $0x20] sm:$0xf] %vm2433_vm0, %v3734_v21  ;;  %v3754_v30 = vmax.bf16 %v3599_v2, %v411_v23  ;;  %v375_v35 = vsel %vm3717_vm6, 0, %v374_v33  ;;  %v402_v36 = vsel %vm3717_vm6, 0, %v401_v34 }
  0x1e   : > { %3210 = vmatprep.mubr.msk.bf16.mxu0 %vm447_vm7, %v2924_v20  ;;  %2472 = vst.msk [vmem:[#allocation3 + $0x28] sm:$0xf] %vm2433_vm0, %v3743_v25  ;;  %2473 = vst.msk [vmem:[#allocation3 + $0x30] sm:$0xf] %vm2433_vm0, %v3745_v26  ;;  %v2925_v37 = vcombine.low %v410_v22, %v411_v23  ;;  %v381_v49 = vsel %vm3717_vm6, 0, %v380_v47  ;;  %v364_v51 = vsel %vm3710_vm5, 0, %v363_v50  ;;  %3357 = vmatpush3.bf16.msra.mxu1 %v3814_v6 }
  0x1f   : > { %371 = vst [vmem:[#allocation2 + $0x48] sm:$0x1] %v370_v32  ;;  %2474 = vst.msk [vmem:[#allocation3 + $0x38] sm:$0xf] %vm2433_vm0, %v3754_v30  ;;  %v395_v52 = vld [vmem:[#allocation2 + $0x3c] sm:$0x1] }
  0x20   : > { %376 = vst [vmem:[#allocation2 + $0x4] sm:$0x1] %v375_v35  ;;  %403 = vst [vmem:[#allocation2 + $0x4c] sm:$0x1] %v402_v36  ;;  %v396_v53 = vsel %vm3717_vm6, 0, %v395_v52  ;;  %v3501_v2 = vld [vmem:[%s4418_s3 + $0x10] sm:$0xff]  }
  0x21   : > { %350 = vst [vmem:[#allocation2 + $0x10] sm:$0x1] %v349_v48  ;;  %382 = vst [vmem:[#allocation2 + $0x14] sm:$0x1] %v381_v49  ;;  %v357_v54 = vld [vmem:[#allocation2 + $0x28] sm:$0x1]  ;;  %3214 = vmatprep.subr.bf16.mxu0 %v3501_v2 }
  0x22   : > { %365 = vst [vmem:[#allocation2 + $0x38] sm:$0x1] %v364_v51  ;;  %397 = vst [vmem:[#allocation2 + $0x3c] sm:$0x1] %v396_v53  ;;  %v358_v55 = vsel %vm3710_vm5, 0, %v357_v54  ;;  %3215 = vmatpush3.bf16.msra.mxu0 %v3501_v2  ;;  %v3823_v7 = vld [vmem:[%s4418_s3 + $0x30] sm:$0xff]  }
  0x23   : > { %359 = vst [vmem:[#allocation2 + $0x28] sm:$0x1] %v358_v55  ;;  %v389_v56 = vld [vmem:[#allocation2 + $0x2c] sm:$0x1]  ;;  %v366_v57 = vld [vmem:[#allocation2 + $0x40] sm:$0x1]  ;;  %3216 = vmatprep.subr.bf16.mxu0 %v3503_v5  ;;  %3250 = vmatprep.subr.bf16.mxu1 %v3823_v7 }
  0x24   : > { %v398_v58 = vld [vmem:[#allocation2 + $0x44] sm:$0x1]  ;;  %v390_v59 = vsel %vm3717_vm6, 0, %v389_v56  ;;  %v367_v60 = vsel %vm3710_vm5, 0, %v366_v57  ;;  %v360_v62 = vld [vmem:[#allocation2 + $0x30] sm:$0x1] }
  0x25   : > { %3211 = vmatmul.mubr.msk.bf16.gmra.mrb[4].mxu0 %vm447_vm7, %v2925_v37  ;;  %v399_v61 = vsel %vm3717_vm6, 0, %v398_v58  ;;  %391 = vst [vmem:[#allocation2 + $0x2c] sm:$0x1] %v390_v59  ;;  %368 = vst [vmem:[#allocation2 + $0x40] sm:$0x1] %v367_v60  ;;  %v361_v0 = vsel %vm3710_vm5, 0, %v360_v62 }
  0x26   : > { %400 = vst [vmem:[#allocation2 + $0x44] sm:$0x1] %v399_v61  ;;  %v392_v63 = vld [vmem:[#allocation2 + $0x34] sm:$0x1]  ;;  %362 = vst [vmem:[#allocation2 + $0x30] sm:$0x1] %v361_v0  ;;  %3217 = vmatpush3.bf16.msra.mxu0 %v3503_v5 }
  0x27   : > { %v393_v1 = vsel %vm3717_vm6, 0, %v392_v63  ;;  %v3829_v8 = vld [vmem:[%s4418_s3] sm:$0xff]   ;;  %v652_v45 = vld [vmem:[#allocation2 + $0x18] sm:$0xf]  ;;  %v655_v46 = vld [vmem:[#allocation2 + $0x1c] sm:$0x1] }
  0x28   : > { %394 = vst [vmem:[#allocation2 + $0x34] sm:$0x1] %v393_v1  ;;  %3226 = vmatprep.subr.bf16.mxu0 %v3829_v8  ;;  %v3832_v9 = vld [vmem:[#allocation2] sm:$0xf]  ;;  %v3849_v39 = vld [vmem:[#allocation2 + $0x4] sm:$0x1] }
  0x29   : > { %v3837_v10 = vld [vmem:[%s4417_s2] ss:$0 sm:$0xff]  ;;  %v712_v11 = vshrl.u32 %v3832_v9, 16  ;;  %v715_v14 = vshll.u32 %v3832_v9, 16  ;;  %v721_v43 = vshll.u32 %v3849_v39, 16  ;;  %vm1063_vm11 = vcmask 1042432  }
  0x2a   : > { %v640_v52 = vld [vmem:[#allocation2 + $0x8] sm:$0xf]  ;;  %v643_v59 = vld [vmem:[#allocation2 + $0xc] sm:$0x1]  ;;  %v658_v5 = vld [vmem:[#allocation2 + $0x20] sm:$0xf] }
  0x2b   : > { %v3844_v31 = vrot.slane %v712_v11, 4  ;;  %v3846_v32 = vrot.slane %v715_v14, 5  ;;  %vm708_vm9 = vsmask.f32 3328  ;;  %vm709_vm10 = vsmask.f32 7440 }
  0x2c   : > { %vm1064_vm12 = vcmask 1046532   ;;  %vm3917_vm13 = vmor %vm708_vm9, %vm709_vm10  ;;  %vm852_vm14 = vcmask 261120   ;;  %vm2435_vm0 = vcmask 122880   ;;  %s323_s28 = sand.u32 1, %s3589_s10   ;;  %v3086_v12 = vld [vmem:[%s4421_s6] ss:$0 sm:$0xff] }
  0x2d   : > { %v718_v42 = vor.u32 %v3846_v32, %v3844_v31  ;;  %vm3959_vm15 = vmor %vm1063_vm11, %vm1064_vm12  ;;  %s2918_s16 = sshll.u32 %s323_s28, 6  ;;  %v3113_v15 = vld [vmem:[%s4423_s8] ss:$0 sm:$0xff]  ;;  %s3128_s23 = sshll.u32 %s3674_s13, 10 }
  0x2e   : > { %vm4247_vm1 = vmand %vm2435_vm0, %vm340_vm3  ;;  %s325_s22 = scalar_lea.vmem [#allocation4], %s2918_s16  ;;  %s4365_s27 = scalar_lea.hbm %s4424_s9, %s3128_s23 }
  0x2f   : > { %s2852_s24 = sshll.u32 %s325_s22, 4  ;;  %s4374_s13 = scalar_lea.sflag [#allocation5], %s323_s28  ;;  %s4367_s24 = int_to_ptr.vmem [resolvable:$true] %s2852_s24 }
  0x30   : > { %s3535_s29 = scalar_lea.vmem %s4367_s24, 1024  ;;  %s3600_s14 = smov [#allocation4]  }
  0x31   : > { %p3536_p11 = scmp.ne.s32.totalorder %s4367_s24, %s3535_s29  ;;  %s3539_s16 = sshll.u32 %s3600_s14, 4  ;;  %s3540_s16 = int_to_ptr.vmem [resolvable:$false] %s3539_s16 }
  0x32   : > { %s3541_s17 = scalar_lea.vmem %s3540_s16, 2048  ;;  %p3542_p0 = scmp.lt.s32.totalorder %s4367_s24, %s3540_s16 }
  0x33   : > { %p3537_p12 = pnand %p3536_p11, %p3691_p5  ;;  %p3543_p1 = scmp.lt.s32.totalorder %s3541_s17, %s3535_s29 }
  0x35   : > { %p3538_p13 = pneg %p3537_p12  ;;  %p3544_p2 = por %p3543_p1, %p3542_p0 }
  0x37   : > { %p3545_p3 = pnand %p3544_p2, %p3538_p13 }
  0xf0   : > { %v3208_v16 = vpop.f32.mrb[0].mxu0 }
  0xf1   : > { %v503_v17 = vadd.f32 %v3208_v16, %v3837_v10  ;;  %v494_v18 = vpop.f32.mrb[1].mxu0 }
  0xf2   : > { %v495_v20 = vadd.f32 %v3837_v10, %v494_v18  ;;  %v3209_v22 = vpop.f32.mrb[2].mxu0  ;;  %v661_v18 = vld [vmem:[#allocation2 + $0x24] sm:$0x1] }
  0xf3   : > { %v527_v23 = vmax.f32 %v503_v17, 0.0  ;;  %v506_v27 = vadd.f32 %v3209_v22, %v3837_v10  ;;  %v497_v28 = vpop.f32.mrb[3].mxu0 }
  0xf4   : > { %v525_v33 = vmax.f32 %v495_v20, 0.0  ;;  %v498_v34 = vadd.f32 %v3837_v10, %v497_v28 }
  0xf5   : > { %v3122_v35 = vpack.c.bf16 %v527_v23, %v527_v23  ;;  %v528_v36 = vmax.f32 %v506_v27, 0.0 }
  0xf6   : > { %v3120_v37 = vpack.c.bf16 %v525_v33, %v525_v33  ;;  %v526_v38 = vmax.f32 %v498_v34, 0.0  ;;  %v646_v34 = vld [vmem:[#allocation2 + $0x10] sm:$0xf] }
  0xf7   : > { %v574_v40 = vshrl.u32 %v3122_v35, 16  ;;  %v3123_v41 = vpack.c.bf16 %v528_v36, %v528_v36  ;;  %v577_v44 = vshll.u32 %v3122_v35, 16  ;;  %v649_v35 = vld [vmem:[#allocation2 + $0x14] sm:$0x1] }
  0xf8   : > { %v558_v47 = vshrl.u32 %v3120_v37, 16  ;;  %v561_v48 = vshll.u32 %v3120_v37, 16  ;;  %v3121_v49 = vpack.c.bf16 %v526_v38, %v526_v38  ;;  %v3212_v50 = vpop.f32.mrb[4].mxu0 }
  0xf9   : > { %v576_v51 = vrot.slane %v574_v40, 7  ;;  %v582_v53 = vshrl.u32 %v3123_v41, 16  ;;  %v585_v54 = vshll.u32 %v3123_v41, 16  ;;  %v519_v55 = vadd.f32 %v3212_v50, %v3837_v10  ;;  %v510_v56 = vpop.f32.mrb[5].mxu0 }
  0xfa   : > { %v560_v58 = vrot.slane %v558_v47, 7  ;;  %v566_v60 = vshrl.u32 %v3121_v49, 16  ;;  %v569_v61 = vshll.u32 %v3121_v49, 16  ;;  %v511_v62 = vadd.f32 %v3837_v10, %v510_v56  ;;  %v3213_v63 = vpop.f32.mrb[6].mxu0 }
  0xfb   : > { %v579_v0 = vor.u32 %v577_v44, %v576_v51  ;;  %v580_v1 = vrot.slane %v576_v51, 4  ;;  %v584_v2 = vrot.slane %v582_v53, 7  ;;  %v531_v11 = vmax.f32 %v519_v55, 0.0  ;;  %v513_v14 = vpop.f32.mrb[7].mxu0  ;;  %v676_v53 = vld [vmem:[#allocation2 + $0x38] sm:$0xf] }
  0xfc   : > { %v563_v16 = vor.u32 %v561_v48, %v560_v58  ;;  %v564_v17 = vrot.slane %v560_v58, 4  ;;  %v568_v20 = vrot.slane %v566_v60, 7  ;;  %v529_v22 = vmax.f32 %v511_v62, 0.0  ;;  %v664_v62 = vld [vmem:[#allocation2 + $0x28] sm:$0xf] }
  0xfd   : > { %v653_v23 = vsel %vm3857_vm8, %v579_v0, %v652_v45  ;;  %v656_v27 = vsel %vm3710_vm5, %v580_v1, %v655_v46  ;;  %v587_v28 = vor.u32 %v585_v54, %v584_v2  ;;  %v588_v33 = vrot.slane %v584_v2, 4  ;;  %v667_v0 = vld [vmem:[#allocation2 + $0x2c] sm:$0x1] }
  0xfe   : > { %654 = vst [vmem:[#allocation2 + $0x18] sm:$0xf] %v653_v23  ;;  %657 = vst [vmem:[#allocation2 + $0x1c] sm:$0x1] %v656_v27  ;;  %v641_v36 = vsel %vm3857_vm8, %v563_v16, %v640_v52  ;;  %v644_v37 = vsel %vm3710_vm5, %v564_v17, %v643_v59  ;;  %v571_v38 = vor.u32 %v569_v61, %v568_v20  ;;  %v572_v40 = vrot.slane %v568_v20, 4 }
  0xff   : > { %642 = vst [vmem:[#allocation2 + $0x8] sm:$0xf] %v641_v36  ;;  %645 = vst [vmem:[#allocation2 + $0xc] sm:$0x1] %v644_v37  ;;  %v659_v41 = vsel %vm3857_vm8, %v587_v28, %v658_v5  ;;  %v662_v44 = vsel %vm3710_vm5, %v588_v33, %v661_v18  ;;  %v3126_v45 = vpack.c.bf16 %v531_v11, %v531_v11  ;;  %v679_v59 = vld [vmem:[#allocation2 + $0x3c] sm:$0x1] }
 0x100   : > { %v3124_v46 = vpack.c.bf16 %v529_v22, %v529_v22  ;;  %660 = vst [vmem:[#allocation2 + $0x20] sm:$0xf] %v659_v41  ;;  %663 = vst [vmem:[#allocation2 + $0x24] sm:$0x1] %v662_v44  ;;  %v647_v47 = vsel %vm3857_vm8, %v571_v38, %v646_v34  ;;  %v650_v48 = vsel %vm3710_vm5, %v572_v40, %v649_v35  ;;  %v3887_v2 = vrot.slane %v721_v43, 5 }
 0x101   : > { %v522_v49 = vadd.f32 %v3213_v63, %v3837_v10  ;;  %v514_v50 = vadd.f32 %v3837_v10, %v513_v14  ;;  %648 = vst [vmem:[#allocation2 + $0x10] sm:$0xf] %v647_v47  ;;  %651 = vst [vmem:[#allocation2 + $0x14] sm:$0x1] %v650_v48  ;;  %v606_v51 = vshrl.u32 %v3126_v45, 16  ;;  %v609_v58 = vshll.u32 %v3126_v45, 16 }
 0x102   : > { %v590_v52 = vshrl.u32 %v3124_v46, 16  ;;  %v593_v61 = vshll.u32 %v3124_v46, 16  ;;  %v3883_v10 = vrot.slane %v718_v42, 4  ;;  %v682_v28 = vld [vmem:[#allocation2 + $0x40] sm:$0xf] }
 0x103   : > { %v532_v54 = vmax.f32 %v522_v49, 0.0  ;;  %v530_v55 = vmax.f32 %v514_v50, 0.0  ;;  %v608_v56 = vrot.slane %v606_v51, 7  ;;  %v685_v33 = vld [vmem:[#allocation2 + $0x44] sm:$0x1] }
 0x104   : > { %v592_v60 = vrot.slane %v590_v52, 7  ;;  %v670_v34 = vld [vmem:[#allocation2 + $0x30] sm:$0xf]  ;;  %v673_v35 = vld [vmem:[#allocation2 + $0x34] sm:$0x1] }
 0x105   : > { %v3127_v1 = vpack.c.bf16 %v532_v54, %v532_v54  ;;  %v3125_v63 = vpack.c.bf16 %v530_v55, %v530_v55  ;;  %v611_v5 = vor.u32 %v609_v58, %v608_v56  ;;  %v612_v11 = vrot.slane %v608_v56, 4  ;;  %v3889_v17 = vld [vmem:[#allocation2 + $0x18] sm:$0xf]  ;;  %v3907_v45 = vld [vmem:[#allocation2] sm:$0xe] }
 0x106   : > { %v595_v14 = vor.u32 %v593_v61, %v592_v60  ;;  %v596_v16 = vrot.slane %v592_v60, 4  ;;  %v3891_v27 = vld [vmem:[#allocation2 + $0x8] sm:$0xf]  ;;  %v3901_v36 = vld [vmem:[#allocation2 + $0xc] sm:$0x1]  ;;  %v754_v50 = vshrl.u32 %v3889_v17, 16  ;;  %v3107_v55 = vcombine.low %v3745_v26, %v3754_v30 }
 0x107   : > { %v614_v18 = vshrl.u32 %v3127_v1, 16  ;;  %v617_v20 = vshll.u32 %v3127_v1, 16  ;;  %v598_v22 = vshrl.u32 %v3125_v63, 16  ;;  %v601_v23 = vshll.u32 %v3125_v63, 16  ;;  %v3931_v63 = vld [vmem:[#allocation2 + $0x24] sm:$0x1] }
 0x108   : > { %v677_v31 = vsel %vm3857_vm8, %v611_v5, %v676_v53  ;;  %v680_v32 = vsel %vm3710_vm5, %v612_v11, %v679_v59  ;;  %v665_v42 = vsel %vm3857_vm8, %v595_v14, %v664_v62  ;;  %v668_v43 = vsel %vm3710_vm5, %v596_v16, %v667_v0  ;;  %v3905_v44 = vld [vmem:[#allocation2 + $0x10] sm:$0xf]  ;;  %v3910_v47 = vld [vmem:[#allocation2 + $0x14] sm:$0x1]  ;;  %v3921_v59 = vld [vmem:[#allocation2 + $0x1c] sm:$0x1] }
 0x109   : > { %678 = vst [vmem:[#allocation2 + $0x38] sm:$0xf] %v677_v31  ;;  %681 = vst [vmem:[#allocation2 + $0x3c] sm:$0x1] %v680_v32  ;;  %v616_v37 = vrot.slane %v614_v18, 7  ;;  %v600_v38 = vrot.slane %v598_v22, 7 }
 0x10a   : > { %666 = vst [vmem:[#allocation2 + $0x28] sm:$0xf] %v665_v42  ;;  %669 = vst [vmem:[#allocation2 + $0x2c] sm:$0x1] %v668_v43  ;;  %v726_v40 = vshrl.u32 %v3891_v27, 16  ;;  %v729_v41 = vshll.u32 %v3891_v27, 16 }
 0x10b   : > { %v735_v46 = vshll.u32 %v3901_v36, 16  ;;  %v740_v48 = vshrl.u32 %v3905_v44, 16  ;;  %v743_v49 = vshll.u32 %v3905_v44, 16  ;;  %v619_v51 = vor.u32 %v617_v20, %v616_v37  ;;  %v1043_v16 = vld [vmem:[#allocation2 + $0x20] sm:$0xe] }
 0x10c   : > { %v620_v52 = vrot.slane %v616_v37, 4  ;;  %v603_v53 = vor.u32 %v601_v23, %v600_v38  ;;  %v604_v54 = vrot.slane %v600_v38, 4  ;;  %v728_v56 = vrot.slane %v726_v40, 4 }
 0x10d   : > { %v731_v58 = vrot.slane %v729_v41, 5  ;;  %v742_v60 = vrot.slane %v740_v48, 4  ;;  %v683_v61 = vsel %vm3857_vm8, %v619_v51, %v682_v28  ;;  %v745_v11 = vrot.slane %v743_v49, 5 }
 0x10e   : > { %v686_v62 = vsel %vm3710_vm5, %v620_v52, %v685_v33  ;;  %v671_v0 = vsel %vm3857_vm8, %v603_v53, %v670_v34  ;;  %v674_v1 = vsel %vm3710_vm5, %v604_v54, %v673_v35  ;;  %684 = vst [vmem:[#allocation2 + $0x40] sm:$0xf] %v683_v61  ;;  %v749_v14 = vshll.u32 %v3910_v47, 16  ;;  %v3944_v33 = vld [vmem:[#allocation2 + $0x20] sm:$0xf] }
 0x10f   : > { %687 = vst [vmem:[#allocation2 + $0x44] sm:$0x1] %v686_v62  ;;  %672 = vst [vmem:[#allocation2 + $0x30] sm:$0xf] %v671_v0  ;;  %v732_v5 = vor.u32 %v731_v58, %v728_v56  ;;  %v2963_v18 = vrot.slane %v3907_v45, 9  ;;  %v737_v20 = vrot.slane %v735_v46, 5  ;;  %v724_v23 = vsel %vm3917_vm13, %v3883_v10, %v3887_v2 }
 0x110   : > { %675 = vst [vmem:[#allocation2 + $0x34] sm:$0x1] %v674_v1  ;;  %v756_v22 = vrot.slane %v754_v50, 4  ;;  %v757_v57 = vshll.u32 %v3889_v17, 16  ;;  %v763_v3 = vshll.u32 %v3921_v59, 16  ;;  %v746_v32 = vor.u32 %v745_v11, %v742_v60  ;;  %v4243_v56 = vld [vmem:[%s4422_s7 + $0x8] sm:$0xff]  }
 0x111   : > { %v733_v31 = vrot.slane %v732_v5, 4  ;;  %v3941_v42 = vld [vmem:[#allocation2 + $0x2c] sm:$0x1]  ;;  %v777_v43 = vshll.u32 %v3931_v63, 16  ;;  %v1044_v28 = vld [vmem:[#allocation2 + $0x28] sm:$0xe] }
 0x112   : > { %v751_v34 = vrot.slane %v749_v14, 5  ;;  %v759_v35 = vrot.slane %v757_v57, 5  ;;  %v765_v37 = vrot.slane %v763_v3, 5  ;;  %v2967_v38 = vrot.slane %v1043_v16, 9  ;;  %v3946_v40 = vld [vmem:[#allocation2 + $0x3c] sm:$0x1] }
 0x113   : > { %v738_v41 = vsel %vm3917_vm13, %v733_v31, %v737_v20  ;;  %v747_v46 = vrot.slane %v746_v32, 4  ;;  %v1084_v10 = vrot.slane %v3931_v63, 5  ;;  %v2968_v2 = vrot.slane %v1044_v28, 9  ;;  %v1046_v48 = vld [vmem:[#allocation2 + $0x38] sm:$0xe] }
 0x114   : > { %v2943_v49 = vcombine.low %v724_v23, %v738_v41  ;;  %v760_v50 = vor.u32 %v759_v35, %v756_v22  ;;  %v791_v51 = vshll.u32 %v3941_v42, 16  ;;  %v1088_v52 = vrot.slane %v3941_v42, 5  ;;  %v3953_v53 = vld [vmem:[#allocation2 + $0x28] sm:$0xf]  ;;  %v3978_v32 = vld [vmem:[#allocation2 + $0x38] sm:$0xf] }
 0x115   : > { %v752_v54 = vsel %vm3917_vm13, %v747_v46, %v751_v34  ;;  %v2970_v58 = vrot.slane %v1046_v48, 9  ;;  %v1096_v60 = vrot.slane %v3946_v40, 5  ;;  %v1085_v62 = vsel %vm3959_vm15, %v2967_v38, %v1084_v10  ;;  %v3506_v48 = vld [vmem:[#allocation2 + $0x8] ss:$8 sps:$4 sm:$0xff]  }
 0x116   : > { %3218 = vmatprep.mubr.msk.bf16.mxu0 %vm852_vm14, %v2943_v49  ;;  %v761_v61 = vrot.slane %v760_v50, 4  ;;  %v1089_v0 = vsel %vm3959_vm15, %v2968_v2, %v1088_v52  ;;  %v1045_v63 = vld [vmem:[#allocation2 + $0x30] sm:$0xe]  ;;  %v768_v5 = vshrl.u32 %v3944_v33, 16  ;;  %v771_v23 = vshll.u32 %v3944_v33, 16  ;;  %v3513_v2 = vld [vmem:[%s4418_s3 + $0x8] sm:$0xff]  }
 0x117   : > { %v706_v1 = vld [vmem:[#allocation2 + $0x34] sm:$0x1]  ;;  %v2977_v11 = vcombine.low %v1085_v62, %v1089_v0  ;;  %v2969_v14 = vrot.slane %v1045_v63, 9  ;;  %v1097_v20 = vsel %vm3959_vm15, %v2970_v58, %v1096_v60  ;;  %v3972_v22 = vld [vmem:[#allocation2 + $0x30] sm:$0xf]  ;;  %v782_v31 = vshrl.u32 %v3953_v53, 16 }
 0x118   : > { %v1092_v16 = vrot.slane %v706_v1, 5  ;;  %v766_v57 = vsel %vm3917_vm13, %v761_v61, %v765_v37  ;;  %v770_v3 = vrot.slane %v768_v5, 4  ;;  %v785_v34 = vshll.u32 %v3953_v53, 16  ;;  %v3507_v37 = vld [vmem:[%s4418_s3 + $0x38] sm:$0xff]   ;;  %v1342_v0 = vld [vmem:[#allocation2 + $0x8] sm:$0xf] }
 0x119   : > { %v2944_v42 = vcombine.low %v752_v54, %v766_v57  ;;  %3246 = vmatprep.mubr.msk.bf16.mxu1 %vm852_vm14, %v2977_v11  ;;  %v796_v35 = vshrl.u32 %v3972_v22, 16  ;;  %v773_v41 = vrot.slane %v771_v23, 5  ;;  %v784_v46 = vrot.slane %v782_v31, 4  ;;  %v1344_v11 = vld [vmem:[#allocation2 + $0x10] sm:$0xf] }
 0x11a   : > { %v1093_v28 = vsel %vm3959_vm15, %v2969_v14, %v1092_v16  ;;  %v799_v10 = vshll.u32 %v3972_v22, 16  ;;  %v787_v49 = vrot.slane %v785_v34, 5  ;;  %v805_v52 = vshll.u32 %v706_v1, 16 }
 0x11b   : > { %v2978_v38 = vcombine.low %v1093_v28, %v1097_v20  ;;  %3219 = vmatmul.mubr.msk.bf16.vlgmr.msra.gmra.mrb[8].mxu0 %vm852_vm14, %v2944_v42  ;;  %v798_v50 = vrot.slane %v796_v35, 4  ;;  %v810_v54 = vshrl.u32 %v3978_v32, 16  ;;  %v774_v58 = vor.u32 %v773_v41, %v770_v3 }
 0x11c   : > { %v801_v60 = vrot.slane %v799_v10, 5  ;;  %v813_v61 = vshll.u32 %v3978_v32, 16  ;;  %v819_v62 = vshll.u32 %v3946_v40, 16  ;;  %3227 = vmatpush3.bf16.msra.mxu0 %v3829_v8  ;;  %v779_v63 = vrot.slane %v777_v43, 5  ;;  %v3510_v8 = vld [vmem:[%s4418_s3 + $0x40] sm:$0xff]  }
 0x11d   : > { %3247 = vmatmul.mubr.msk.bf16.vlgmr.msra.gmra.mrb[0].mxu1 %vm852_vm14, %v2978_v38  ;;  %v788_v5 = vor.u32 %v787_v49, %v784_v46  ;;  %v812_v1 = vrot.slane %v810_v54, 4  ;;  %v1068_v14 = vrot.slane %v3849_v39, 5  ;;  %v793_v16 = vrot.slane %v791_v51, 5  ;;  %3228 = vmatprep.subr.bf16.mxu0 %v3513_v2  ;;  %v4010_v38 = vld [vmem:[#allocation2 + $0x14] sm:$0x1] }
 0x11e   : > { %3251 = vmatpush3.bf16.msra.mxu1 %v3823_v7  ;;  %3254 = vmatprep.mubr.msk.bf16.mxu1 %vm852_vm14, %v3506_v48  ;;  %v775_v20 = vrot.slane %v774_v58, 4  ;;  %v802_v57 = vor.u32 %v801_v60, %v798_v50  ;;  %v815_v3 = vrot.slane %v813_v61, 5  ;;  %v807_v40 = vrot.slane %v805_v52, 5  ;;  %v4004_v7 = vld [vmem:[#allocation2 + $0xc] sm:$0x1] }
 0x11f   : > { %3252 = vmatprep.subr.bf16.mxu1 %v3507_v37  ;;  %v789_v43 = vrot.slane %v788_v5, 4  ;;  %v1359_v23 = vshrl.u32 %v1342_v0, 16  ;;  %v1362_v31 = vshll.u32 %v1342_v0, 16  ;;  %v821_v34 = vrot.slane %v819_v62, 5  ;;  %v1346_v10 = vld [vmem:[#allocation2 + $0x18] sm:$0xf] }
 0x120   : > { %v803_v42 = vrot.slane %v802_v57, 4  ;;  %v816_v28 = vor.u32 %v815_v3, %v812_v1  ;;  %3229 = vmatpush3.bf16.msra.mxu0 %v3513_v2  ;;  %v1373_v39 = vshrl.u32 %v1344_v11, 16  ;;  %v780_v51 = vsel %vm3917_vm13, %v775_v20, %v779_v63  ;;  %v3511_v50 = vld [vmem:[#allocation2 + $0x18] ss:$8 sps:$4 sm:$0xff]   ;;  %v3516_v52 = vld [vmem:[%s4418_s3 + $0x48] sm:$0xff]   ;;  %v4036_v3 = vld [vmem:[%s4418_s3 + $0x50] sm:$0xff]  }
 0x121   : > { %v794_v35 = vsel %vm3917_vm13, %v789_v43, %v793_v16  ;;  %v1361_v41 = vrot.slane %v1359_v23, 4  ;;  %v1364_v46 = vrot.slane %v1362_v31, 5  ;;  %3238 = vmatprep.subr.bf16.mxu0 %v3806_v4  ;;  %v3512_v54 = vld [vmem:[#allocation2 + $0x28] ss:$8 sps:$4 sm:$0xff]   ;;  %v1376_v61 = vshll.u32 %v1344_v11, 16 }
 0x122   : > { %3253 = vmatpush3.bf16.msra.mxu1 %v3507_v37  ;;  %v2945_v48 = vcombine.low %v780_v51, %v794_v35  ;;  %v808_v49 = vsel %vm3917_vm13, %v803_v42, %v807_v40  ;;  %v817_v2 = vrot.slane %v816_v28, 4  ;;  %v1368_v37 = vshll.u32 %v4004_v7, 16  ;;  %v1040_v63 = vld [vmem:[#allocation2 + $0x8] sm:$0xe]  ;;  %v1348_v5 = vld [vmem:[#allocation2 + $0x20] sm:$0xf] }
 0x123   : > { %3262 = vmatprep.subr.bf16.mxu1 %v3510_v8  ;;  %v1365_v58 = vor.u32 %v1364_v46, %v1361_v41  ;;  %v1375_v60 = vrot.slane %v1373_v39, 4  ;;  %v1382_v0 = vshll.u32 %v4010_v38, 16  ;;  %v1387_v1 = vshrl.u32 %v1346_v10, 16  ;;  %v4038_v43 = vld [vmem:[#allocation2 + $0x1c] sm:$0x1] }
 0x124   : > { %3222 = vmatprep.mubr.msk.bf16.mxu0 %vm852_vm14, %v2945_v48  ;;  %v822_v62 = vsel %vm3917_vm13, %v817_v2, %v821_v34  ;;  %v2953_v20 = vcombine.low %v3832_v9, %v3891_v27  ;;  %v1378_v11 = vrot.slane %v1376_v61, 5  ;;  %v4031_v57 = vsel %vm3959_vm15, %v2963_v18, %v1068_v14  ;;  %v1350_v23 = vld [vmem:[#allocation2 + $0x28] sm:$0xf]  ;;  %v4042_v14 = vld [vmem:[#allocation2 + $0x24] sm:$0x1] }
 0x125   : > { %3255 = vmatmul.mubr.msk.bf16.vlgmr.msra.gmra.mrb[4].mxu1 %vm852_vm14, %v3511_v50  ;;  %v2946_v16 = vcombine.low %v808_v49, %v822_v62  ;;  %v1366_v40 = vrot.slane %v1365_v58, 4  ;;  %v1370_v9 = vrot.slane %v1368_v37, 5  ;;  %v1389_v27 = vrot.slane %v1387_v1, 4  ;;  %v1352_v35 = vld [vmem:[#allocation2 + $0x30] sm:$0xf] }
 0x126   : > { %3263 = vmatpush3.bf16.msra.mxu1 %v3510_v8  ;;  %3258 = vmatprep.mubr.msk.bf16.mxu1 %vm852_vm14, %v3512_v54  ;;  %v1390_v8 = vshll.u32 %v1346_v10, 16  ;;  %v1379_v45 = vor.u32 %v1378_v11, %v1375_v60  ;;  %v2964_v31 = vrot.slane %v1040_v63, 9  ;;  %v1072_v18 = vrot.slane %v3901_v36, 5  ;;  %v3517_v49 = vld [vmem:[#allocation2 + $0x38] ss:$8 sps:$4 sm:$0xff]  }
 0x127   : > { %3264 = vmatprep.subr.bf16.mxu1 %v3516_v52  ;;  %3223 = vmatmul.mubr.msk.bf16.gmra.mrb[12].mxu0 %vm852_vm14, %v2946_v16  ;;  %v1401_v42 = vshrl.u32 %v1348_v5, 16  ;;  %v1384_v28 = vrot.slane %v1382_v0, 5  ;;  %v1396_v39 = vshll.u32 %v4038_v43, 16  ;;  %v1404_v51 = vshll.u32 %v1348_v5, 16  ;;  %v4052_v58 = vld [vmem:[#allocation2 + $0x2c] sm:$0x1] }
 0x128   : > { %3230 = vmatprep.mubr.msk.bf16.mxu0 %vm852_vm14, %v2953_v20  ;;  %v1392_v34 = vrot.slane %v1390_v8, 5  ;;  %v1380_v41 = vrot.slane %v1379_v45, 4  ;;  %v1415_v10 = vshrl.u32 %v1350_v23, 16  ;;  %v1418_v48 = vshll.u32 %v1350_v23, 16  ;;  %v4059_v1 = vld [vmem:[#allocation2 + $0x34] sm:$0x1] }
 0x129   : > { %v1403_v46 = vrot.slane %v1401_v42, 4  ;;  %v1371_v36 = vsel %vm3917_vm13, %v1366_v40, %v1370_v9  ;;  %v1406_v50 = vrot.slane %v1404_v51, 5  ;;  %v1410_v37 = vshll.u32 %v4042_v14, 16  ;;  %v1354_v16 = vld [vmem:[#allocation2 + $0x38] sm:$0xf] }
 0x12a   : > { %3265 = vmatpush3.bf16.msra.mxu1 %v3516_v52  ;;  %v1393_v2 = vor.u32 %v1392_v34, %v1389_v27  ;;  %v1385_v54 = vsel %vm3917_vm13, %v1380_v41, %v1384_v28  ;;  %v1417_v52 = vrot.slane %v1415_v10, 4  ;;  %v1420_v60 = vrot.slane %v1418_v48, 5  ;;  %v1356_v27 = vld [vmem:[#allocation2 + $0x40] sm:$0xf]  ;;  %v1041_v42 = vld [vmem:[#allocation2 + $0x10] sm:$0xe] }
 0x12b   : > { %3274 = vmatprep.subr.bf16.mxu1 %v4036_v3  ;;  %v1429_v61 = vshrl.u32 %v1352_v35, 16  ;;  %v2954_v62 = vcombine.low %v3905_v44, %v3889_v17  ;;  %v2955_v0 = vcombine.low %v3944_v33, %v3953_v53  ;;  %v3003_v63 = vcombine.low %v1371_v36, %v1385_v54  ;;  %v4067_v28 = vld [vmem:[#allocation2 + $0x3c] sm:$0x1]  ;;  %v4075_v51 = vld [vmem:[#allocation2 + $0x44] sm:$0x1] }
 0x12c   : > { %v1407_v5 = vor.u32 %v1406_v50, %v1403_v46  ;;  %v1394_v20 = vrot.slane %v1393_v2, 4  ;;  %v1421_v11 = vor.u32 %v1420_v60, %v1417_v52  ;;  %v1432_v9 = vshll.u32 %v1352_v35, 16  ;;  %v1585_v48 = vld [vmem:[#allocation2 + $0x10] sm:$0xe]  ;;  %v1042_v52 = vld [vmem:[#allocation2 + $0x18] sm:$0xe] }
 0x12d   : > { %3259 = vmatmul.mubr.msk.bf16.gmra.mrb[0].mxu1 %vm852_vm14, %v3517_v49  ;;  %v1431_v40 = vrot.slane %v1429_v61, 4  ;;  %v1073_v17 = vsel %vm3959_vm15, %v2964_v31, %v1072_v18  ;;  %v1412_v8 = vrot.slane %v1410_v37, 5  ;;  %v1424_v33 = vshll.u32 %v4052_v58, 16 }
 0x12e   : > { %3266 = vmatprep.mubr.msk.bf16.mxu1 %vm852_vm14, %v3003_v63  ;;  %v1408_v44 = vrot.slane %v1407_v5, 4  ;;  %v1398_v53 = vrot.slane %v1396_v39, 5  ;;  %v1434_v23 = vrot.slane %v1432_v9, 5  ;;  %v1438_v45 = vshll.u32 %v4059_v1, 16 }
 0x12f   : > { %3231 = vmatmul.mubr.msk.bf16.vlgmr.msra.gmra.mrb[8].mxu0 %vm852_vm14, %v2954_v62  ;;  %v2956_v34 = vcombine.low %v3972_v22, %v3978_v32  ;;  %v1422_v18 = vrot.slane %v1421_v11, 4  ;;  %v1443_v39 = vshrl.u32 %v1354_v16, 16  ;;  %v2975_v35 = vcombine.low %v4031_v57, %v1073_v17 }
 0x130   : > { %3234 = vmatprep.mubr.msk.bf16.mxu0 %vm852_vm14, %v2955_v0  ;;  %3239 = vmatpush3.bf16.msra.mxu0 %v3806_v4  ;;  %v1413_v31 = vsel %vm3917_vm13, %v1408_v44, %v1412_v8  ;;  %v1399_v41 = vsel %vm3917_vm13, %v1394_v20, %v1398_v53  ;;  %v1435_v46 = vor.u32 %v1434_v23, %v1431_v40  ;;  %v1446_v10 = vshll.u32 %v1354_v16, 16  ;;  %v3520_v4 = vld [vmem:[%s4418_s3 + $0x58] sm:$0xff]   ;;  %v1584_v20 = vld [vmem:[#allocation2 + $0x8] sm:$0xe] }
 0x131   : > { %3240 = vmatprep.subr.bf16.mxu0 %v3814_v6  ;;  %v3004_v22 = vcombine.low %v1399_v41, %v1413_v31  ;;  %v1426_v32 = vrot.slane %v1424_v33, 5  ;;  %v1445_v49 = vrot.slane %v1443_v39, 4  ;;  %v1457_v36 = vshrl.u32 %v1356_v27, 16  ;;  %v1586_v41 = vld [vmem:[#allocation2 + $0x18] sm:$0xe] }
 0x132   : > { %v1436_v2 = vrot.slane %v1435_v46, 4  ;;  %v1440_v50 = vrot.slane %v1438_v45, 5  ;;  %v1448_v37 = vrot.slane %v1446_v10, 5  ;;  %v1460_v57 = vshll.u32 %v1356_v27, 16  ;;  %v3521_v27 = vld [vmem:[%s4418_s3 + $0x60] sm:$0xff]  }
 0x133   : > { %v1427_v54 = vsel %vm3917_vm13, %v1422_v18, %v1426_v32  ;;  %v2965_v60 = vrot.slane %v1041_v42, 9  ;;  %v1452_v61 = vshll.u32 %v4067_v28, 16  ;;  %v1459_v62 = vrot.slane %v1457_v36, 4  ;;  %v1589_v18 = vld [vmem:[#allocation2 + $0x30] sm:$0xe] }
 0x134   : > { %3241 = vmatpush3.bf16.msra.mxu0 %v3814_v6  ;;  %v1441_v0 = vsel %vm3917_vm13, %v1436_v2, %v1440_v50  ;;  %v1449_v63 = vor.u32 %v1448_v37, %v1445_v49  ;;  %v1462_v5 = vrot.slane %v1460_v57, 5  ;;  %v1466_v16 = vshll.u32 %v4075_v51, 16  ;;  %v1588_v32 = vld [vmem:[#allocation2 + $0x28] sm:$0xe] }
 0x135   : > { %3267 = vmatmul.mubr.msk.bf16.vlgmr.msra.gmra.mrb[4].mxu1 %vm852_vm14, %v3004_v22  ;;  %v3005_v11 = vcombine.low %v1427_v54, %v1441_v0  ;;  %v1076_v40 = vrot.slane %v3910_v47, 5  ;;  %v3014_v6 = vrot.slane %v1585_v48, 9  ;;  %v1614_v9 = vrot.slane %v4010_v38, 5  ;;  %v1591_v54 = vld [vmem:[#allocation2 + $0x40] sm:$0xe] }
 0x136   : > { %3275 = vmatpush3.bf16.msra.mxu1 %v4036_v3  ;;  %v1450_v3 = vrot.slane %v1449_v63, 4  ;;  %v1463_v17 = vor.u32 %v1462_v5, %v1459_v62  ;;  %v2966_v44 = vrot.slane %v1042_v52, 9  ;;  %v1080_v8 = vrot.slane %v3921_v59, 5 }
 0x137   : > { %3276 = vmatprep.subr.bf16.mxu1 %v3520_v4  ;;  %3235 = vmatmul.mubr.msk.bf16.gmra.mrb[12].mxu0 %vm852_vm14, %v2956_v34  ;;  %v3013_v47 = vrot.slane %v1584_v20, 9  ;;  %v1610_v33 = vrot.slane %v4004_v7, 5  ;;  %v1454_v53 = vrot.slane %v1452_v61, 5  ;;  %v1468_v23 = vrot.slane %v1466_v16, 5  ;;  %v1587_v34 = vld [vmem:[#allocation2 + $0x20] sm:$0xe] }
 0x138   : > { %3242 = vmatprep.mubr.msk.bf16.mxu0 %vm852_vm14, %v2975_v35  ;;  %3270 = vmatprep.mubr.msk.bf16.mxu1 %vm852_vm14, %v3005_v11  ;;  %v1464_v38 = vrot.slane %v1463_v17, 4  ;;  %v1077_v45 = vsel %vm3959_vm15, %v2965_v60, %v1076_v40  ;;  %v1615_v42 = vsel %vm3959_vm15, %v3014_v6, %v1614_v9  ;;  %v1081_v7 = vsel %vm3959_vm15, %v2966_v44, %v1080_v8  ;;  %v1590_v61 = vld [vmem:[#allocation2 + $0x38] sm:$0xe]  ;;  %v1885_v16 = vld [vmem:[#allocation2 + $0x10] sm:$0xf] }
 0x139   : > { %v1455_v31 = vsel %vm3917_vm13, %v1450_v3, %v1454_v53  ;;  %v1611_v35 = vsel %vm3959_vm15, %v3013_v47, %v1610_v33  ;;  %v2976_v46 = vcombine.low %v1077_v45, %v1081_v7  ;;  %v3016_v48 = vrot.slane %v1587_v34, 9  ;;  %v3524_v20 = vld [vmem:[%s4418_s3 + $0x70] sm:$0xff]   ;;  %v1887_v40 = vld [vmem:[#allocation2 + $0x18] sm:$0xf]  ;;  %v1891_v47 = vld [vmem:[#allocation2 + $0x28] sm:$0xf] }
 0x13a   : > { %3277 = vmatpush3.bf16.msra.mxu1 %v3520_v4  ;;  %v1469_v59 = vsel %vm3917_vm13, %v1464_v38, %v1468_v23  ;;  %v3025_v10 = vcombine.low %v1611_v35, %v1615_v42  ;;  %v1622_v22 = vrot.slane %v4042_v14, 5  ;;  %v3018_v4 = vrot.slane %v1589_v18, 9  ;;  %v3523_v17 = vld [vmem:[#allocation2 + $0x10] ss:$8 sps:$4 sm:$0xff]   ;;  %v1889_v23 = vld [vmem:[#allocation2 + $0x20] sm:$0xf] }
 0x13b   : > { %3286 = vmatprep.subr.bf16.mxu1 %v3521_v27  ;;  %v3006_v39 = vcombine.low %v1455_v31, %v1469_v59  ;;  %v1630_v49 = vrot.slane %v4059_v1, 5  ;;  %v3015_v36 = vrot.slane %v1586_v41, 9  ;;  %v1618_v2 = vrot.slane %v4038_v43, 5  ;;  %v3522_v43 = vld [vmem:[%s4418_s3 + $0x68] sm:$0xff]   ;;  %v1893_v33 = vld [vmem:[#allocation2 + $0x30] sm:$0xf] }
 0x13c   : > { %v3017_v50 = vrot.slane %v1588_v32, 9  ;;  %v1626_v37 = vrot.slane %v4052_v58, 5  ;;  %v1623_v57 = vsel %vm3959_vm15, %v3016_v48, %v1622_v22  ;;  %v3020_v62 = vrot.slane %v1591_v54, 9  ;;  %v4146_v45 = vld [vmem:[#allocation2 + $0x14] sm:$0x1]  ;;  %v3527_v48 = vld [vmem:[%s4418_s3 + $0x78] sm:$0xff]  }
 0x13d   : > { %3271 = vmatmul.mubr.msk.bf16.gmra.mrb[0].mxu1 %vm852_vm14, %v3006_v39  ;;  %v1631_v14 = vsel %vm3959_vm15, %v3018_v4, %v1630_v49  ;;  %v1619_v1 = vsel %vm3959_vm15, %v3015_v36, %v1618_v2  ;;  %v1638_v0 = vrot.slane %v4075_v51, 5  ;;  %v3019_v63 = vrot.slane %v1590_v61, 9  ;;  %v1895_v31 = vld [vmem:[#allocation2 + $0x38] sm:$0xf]  ;;  %v4148_v39 = vld [vmem:[#allocation2 + $0x1c] sm:$0x1] }
 0x13e   : > { %3278 = vmatprep.mubr.msk.bf16.mxu1 %vm852_vm14, %v3025_v10  ;;  %v3026_v52 = vcombine.low %v1619_v1, %v1623_v57  ;;  %v1627_v60 = vsel %vm3959_vm15, %v3017_v50, %v1626_v37  ;;  %v1634_v5 = vrot.slane %v4067_v28, 5  ;;  %v1902_v6 = vshrl.u32 %v1885_v16, 16  ;;  %v3525_v10 = vld [vmem:[#allocation2 + $0x20] ss:$8 sps:$4 sm:$0xff]   ;;  %v3526_v36 = vld [vmem:[#allocation2 + $0x30] ss:$8 sps:$4 sm:$0xff]  }
 0x13f   : > { %3243 = vmatmul.mubr.msk.bf16.vlgmr.msra.gmra.mrb[8].mxu0 %vm852_vm14, %v2976_v46  ;;  %v3027_v58 = vcombine.low %v1627_v60, %v1631_v14  ;;  %v1639_v11 = vsel %vm3959_vm15, %v3020_v62, %v1638_v0  ;;  %v1905_v51 = vshll.u32 %v1885_v16, 16  ;;  %v1916_v3 = vshrl.u32 %v1887_v40, 16  ;;  %v1899_v46 = vld [vmem:[#allocation2 + $0x48] sm:$0xf]  ;;  %v1897_v1 = vld [vmem:[#allocation2 + $0x40] sm:$0xf] }
 0x140   : > { %v1635_v9 = vsel %vm3959_vm15, %v3019_v63, %v1634_v5  ;;  %v1919_v28 = vshll.u32 %v1887_v40, 16  ;;  %v1904_v44 = vrot.slane %v1902_v6, 4  ;;  %v1944_v42 = vshrl.u32 %v1891_v47, 16  ;;  %v4162_v63 = vld [vmem:[#allocation2 + $0x2c] sm:$0x1] }
 0x141   : > { %v1907_v8 = vrot.slane %v1905_v51, 5  ;;  %v1918_v53 = vrot.slane %v1916_v3, 4  ;;  %v1947_v34 = vshll.u32 %v1891_v47, 16  ;;  %v1958_v18 = vshrl.u32 %v1893_v33, 16  ;;  %v4166_v40 = vld [vmem:[#allocation2 + $0x34] sm:$0x1] }
 0x142   : > { %v1921_v38 = vrot.slane %v1919_v28, 5  ;;  %v1961_v7 = vshll.u32 %v1893_v33, 16  ;;  %v1930_v35 = vshrl.u32 %v1889_v23, 16  ;;  %v1933_v41 = vshll.u32 %v1889_v23, 16  ;;  %v3528_v33 = vld [vmem:[#allocation2 + $0x40] ss:$8 sps:$4 sm:$0xff]  }
 0x143   : > { %v1908_v59 = vor.u32 %v1907_v8, %v1904_v44  ;;  %v1911_v22 = vshll.u32 %v4146_v45, 16  ;;  %v1972_v4 = vshrl.u32 %v1895_v31, 16  ;;  %v1975_v49 = vshll.u32 %v1895_v31, 16  ;;  %v4171_v44 = vld [vmem:[#allocation2 + $0x3c] sm:$0x1] }
 0x144   : > { %v1922_v32 = vor.u32 %v1921_v38, %v1918_v53  ;;  %v1946_v2 = vrot.slane %v1944_v42, 4  ;;  %v1949_v50 = vrot.slane %v1947_v34, 5  ;;  %v1925_v57 = vshll.u32 %v4148_v39, 16 }
 0x145   : > { %3279 = vmatmul.mubr.msk.bf16.vlgmr.msra.gmra.mrb[4].mxu1 %vm852_vm14, %v3026_v52  ;;  %v1909_v37 = vrot.slane %v1908_v59, 4  ;;  %v1960_v14 = vrot.slane %v1958_v18, 4  ;;  %v1963_v54 = vrot.slane %v1961_v7, 5  ;;  %v4160_v52 = vld [vmem:[%s4418_s3 + $0x80] sm:$0xff]   ;;  %v1932_v60 = vrot.slane %v1930_v35, 4 }
 0x146   : > { %3287 = vmatpush3.bf16.msra.mxu1 %v3521_v27  ;;  %3282 = vmatprep.mubr.msk.bf16.mxu1 %vm852_vm14, %v3027_v58  ;;  %v3028_v27 = vcombine.low %v1635_v9, %v1639_v11  ;;  %v2000_v61 = vshrl.u32 %v1899_v46, 16  ;;  %v2003_v58 = vshll.u32 %v1899_v46, 16  ;;  %v1913_v62 = vrot.slane %v1911_v22, 5  ;;  %v4164_v11 = vld [vmem:[#allocation2 + $0x24] sm:$0x1] }
 0x147   : > { %3288 = vmatprep.subr.bf16.mxu1 %v3522_v43  ;;  %v1923_v0 = vrot.slane %v1922_v32, 4  ;;  %v1974_v5 = vrot.slane %v1972_v4, 4  ;;  %v1977_v16 = vrot.slane %v1975_v49, 5  ;;  %v1986_v6 = vshrl.u32 %v1897_v1, 16  ;;  %v4181_v22 = vld [vmem:[#allocation2 + $0x44] sm:$0x1] }
 0x148   : > { %v1989_v51 = vshll.u32 %v1897_v1, 16  ;;  %v1914_v9 = vsel %vm3917_vm13, %v1909_v37, %v1913_v62  ;;  %v1964_v3 = vor.u32 %v1963_v54, %v1960_v14  ;;  %v2002_v8 = vrot.slane %v2000_v61, 4  ;;  %v4183_v32 = vld [vmem:[#allocation2 + $0x4c] sm:$0x1]  ;;  %v2127_v1 = vld [vmem:[#allocation2 + $0x10] sm:$0xe] }
 0x149   : > { %v2005_v47 = vrot.slane %v2003_v58, 5  ;;  %v1939_v38 = vshll.u32 %v4164_v11, 16  ;;  %v1967_v23 = vshll.u32 %v4166_v40, 16  ;;  %v1978_v42 = vor.u32 %v1977_v16, %v1974_v5  ;;  %v3530_v61 = vld [vmem:[%s4418_s3 + $0x88] sm:$0xff]   ;;  %v2128_v16 = vld [vmem:[#allocation2 + $0x18] sm:$0xe] }
 0x14a   : > { %3289 = vmatpush3.bf16.msra.mxu1 %v3522_v43  ;;  %v1935_v43 = vrot.slane %v1933_v41, 5  ;;  %v1988_v59 = vrot.slane %v1986_v6, 4  ;;  %v1991_v18 = vrot.slane %v1989_v51, 5  ;;  %v1965_v7 = vrot.slane %v1964_v3, 4 }
 0x14b   : > { %3298 = vmatprep.subr.bf16.mxu1 %v3524_v20  ;;  %v1981_v35 = vshll.u32 %v4171_v44, 16  ;;  %v2006_v4 = vor.u32 %v2005_v47, %v2002_v8  ;;  %v1941_v49 = vrot.slane %v1939_v38, 5  ;;  %v1995_v54 = vshll.u32 %v4181_v22, 16  ;;  %v2130_v8 = vld [vmem:[#allocation2 + $0x28] sm:$0xe] }
 0x14c   : > { %v1936_v28 = vor.u32 %v1935_v43, %v1932_v60  ;;  %v2153_v6 = vrot.slane %v4146_v45, 5  ;;  %v2131_v45 = vld [vmem:[#allocation2 + $0x30] sm:$0xe]  ;;  %v3066_v38 = vrot.slane %v2130_v8, 9 }
 0x14d   : > { %3283 = vmatmul.mubr.msk.bf16.gmra.mrb[0].mxu1 %vm852_vm14, %v3028_v27  ;;  %v1927_v27 = vrot.slane %v1925_v57, 5  ;;  %v1983_v57 = vrot.slane %v1981_v35, 5  ;;  %v1997_v51 = vrot.slane %v1995_v54, 5 }
 0x14e   : > { %3290 = vmatprep.mubr.msk.bf16.mxu1 %vm852_vm14, %v3523_v17  ;;  %v1953_v17 = vshll.u32 %v4162_v63, 16  ;;  %v1937_v41 = vrot.slane %v1936_v28, 4 }
 0x14f   : > { %v1928_v53 = vsel %vm3917_vm13, %v1923_v0, %v1927_v27  ;;  %v2007_v0 = vrot.slane %v2006_v4, 4  ;;  %v2157_v27 = vrot.slane %v4148_v39, 5  ;;  %v2165_v39 = vrot.slane %v4162_v63, 5 }
 0x150   : > { %v3053_v34 = vcombine.low %v1914_v9, %v1928_v53  ;;  %v1955_v46 = vrot.slane %v1953_v17, 5  ;;  %v1942_v14 = vsel %vm3917_vm13, %v1937_v41, %v1941_v49  ;;  %v3064_v9 = vrot.slane %v2128_v16, 9  ;;  %v2134_v41 = vld [vmem:[#allocation2 + $0x48] sm:$0xe]  ;;  %v2455_v16 = vld [vmem:[#allocation3 + $0x2c] sm:$0x1] }
 0x151   : > { %v2166_v35 = vsel %vm3959_vm15, %v3066_v38, %v2165_v39  ;;  %v3070_v4 = vrot.slane %v2134_v41, 9 }
 0x152   : > { %v2158_v47 = vsel %vm3959_vm15, %v3064_v9, %v2157_v27  ;;  %v2437_v9 = vld [vmem:[#allocation3 + $0x44] sm:$0x1]  ;;  %v2461_v27 = vld [vmem:[#allocation3 + $0x3c] sm:$0x1] }
 0x155   : > { %3291 = vmatmul.mubr.msk.bf16.vlgmr.msra.gmra.mrb[4].mxu1 %vm852_vm14, %v3525_v10  ;;  %v1969_v10 = vrot.slane %v1967_v23, 5  ;;  %v2132_v23 = vld [vmem:[#allocation2 + $0x38] sm:$0xe] }
 0x156   : > { %3299 = vmatpush3.bf16.msra.mxu1 %v3524_v20  ;;  %3294 = vmatprep.mubr.msk.bf16.mxu1 %vm852_vm14, %v3526_v36  ;;  %v1950_v20 = vor.u32 %v1949_v50, %v1946_v2  ;;  %v1992_v2 = vor.u32 %v1991_v18, %v1988_v59  ;;  %v2009_v50 = vshll.u32 %v4183_v32, 16  ;;  %v2161_v59 = vrot.slane %v4164_v11, 5 }
 0x157   : > { %3300 = vmatprep.subr.bf16.mxu1 %v3527_v48  ;;  %v1970_v37 = vsel %vm3917_vm13, %v1965_v7, %v1969_v10  ;;  %v3068_v18 = vrot.slane %v2132_v23, 9  ;;  %v2173_v7 = vrot.slane %v4171_v44, 5  ;;  %v2177_v44 = vrot.slane %v4181_v22, 5  ;;  %v3532_v22 = vld [vmem:[%s4420_s5 + $0x8] sm:$0xff]  }
 0x158   : > { %v1951_v31 = vrot.slane %v1950_v20, 4  ;;  %v1993_v62 = vrot.slane %v1992_v2, 4  ;;  %v2011_v5 = vrot.slane %v2009_v50, 5  ;;  %v3063_v20 = vrot.slane %v2127_v1, 9  ;;  %v2446_v1 = vld [vmem:[#allocation3 + $0x14] sm:$0x1] }
 0x15a   : > { %3301 = vmatpush3.bf16.msra.mxu1 %v3527_v48  ;;  %v1979_v48 = vrot.slane %v1978_v42, 4  ;;  %v1956_v36 = vsel %vm3917_vm13, %v1951_v31, %v1955_v46  ;;  %v1998_v3 = vsel %vm3917_vm13, %v1993_v62, %v1997_v51  ;;  %v2012_v28 = vsel %vm3917_vm13, %v2007_v0, %v2011_v5  ;;  %v2133_v46 = vld [vmem:[#allocation2 + $0x40] sm:$0xe]  ;;  %v2452_v0 = vld [vmem:[#allocation3 + $0x24] sm:$0x1] }
 0x15b   : > { %3310 = vmatprep.subr.bf16.mxu1 %v4160_v52  ;;  %v3054_v60 = vcombine.low %v1942_v14, %v1956_v36  ;;  %v2154_v17 = vsel %vm3959_vm15, %v3063_v20, %v2153_v6  ;;  %v3067_v42 = vrot.slane %v2131_v45, 9  ;;  %v3069_v49 = vrot.slane %v2133_v46, 9  ;;  %v2443_v14 = vld [vmem:[#allocation3 + $0xc] sm:$0x1]  ;;  %v2458_v20 = vld [vmem:[#allocation3 + $0x34] sm:$0x1] }
 0x15c   : > { %v1984_v43 = vsel %vm3917_vm13, %v1979_v48, %v1983_v57  ;;  %v3075_v53 = vcombine.low %v2154_v17, %v2158_v47  ;;  %v2174_v48 = vsel %vm3959_vm15, %v3068_v18, %v2173_v7  ;;  %v2181_v36 = vrot.slane %v4183_v32, 5  ;;  %v3531_v57 = vld [vmem:[%s4420_s5] sm:$0xff]   ;;  %v2440_v32 = vld [vmem:[#allocation3 + $0x4] sm:$0x1]  ;;  %v2480_v18 = vld [vmem:[#allocation3 + $0x18] sm:$0xf] }
 0x15d   : > { %3295 = vmatmul.mubr.msk.bf16.gmra.mrb[0].mxu1 %vm852_vm14, %v3528_v33  ;;  %v3055_v58 = vcombine.low %v1970_v37, %v1984_v43  ;;  %v2129_v33 = vld [vmem:[#allocation2 + $0x20] sm:$0xe]  ;;  %v2178_v2 = vsel %vm3959_vm15, %v3069_v49, %v2177_v44  ;;  %3322 = vmatprep.subr.bf16.mxu0 %v3531_v57  ;;  %v2444_v43 = vsel %vm4247_vm1, 0, %v2443_v14  ;;  %v2453_v5 = vsel %vm4247_vm1, 0, %v2452_v0  ;;  %v2482_v7 = vld [vmem:[#allocation3 + $0x20] sm:$0xf] }
 0x15e   : > { %3302 = vmatprep.mubr.msk.bf16.mxu1 %vm852_vm14, %v3053_v34  ;;  %v2169_v34 = vrot.slane %v4166_v40, 5  ;;  %v3065_v31 = vrot.slane %v2129_v33, 9  ;;  %v2182_v50 = vsel %vm3959_vm15, %v3070_v4, %v2181_v36  ;;  %3323 = vmatpush3.bf16.msra.mxu0 %v3531_v57  ;;  %2445 = vst [vmem:[#allocation3 + $0xc] sm:$0x1] %v2444_v43  ;;  %2454 = vst [vmem:[#allocation3 + $0x24] sm:$0x1] %v2453_v5 }
 0x15f   : > { %v3078_v37 = vcombine.low %v2178_v2, %v2182_v50  ;;  %3324 = vmatprep.subr.bf16.mxu0 %v3532_v22  ;;  %v2456_v6 = vsel %vm4247_vm1, 0, %v2455_v16  ;;  %v2459_v51 = vsel %vm4247_vm1, 0, %v2458_v20  ;;  %v2524_v46 = vshll.u32 %v2480_v18, 16  ;;  %v2484_v43 = vld [vmem:[#allocation3 + $0x28] sm:$0xf] }
 0x160   : > { %v2170_v63 = vsel %vm3959_vm15, %v3067_v42, %v2169_v34  ;;  %v2162_v10 = vsel %vm3959_vm15, %v3065_v31, %v2161_v59  ;;  %2457 = vst [vmem:[#allocation3 + $0x2c] sm:$0x1] %v2456_v6  ;;  %2460 = vst [vmem:[#allocation3 + $0x34] sm:$0x1] %v2459_v51  ;;  %v2476_v42 = vld [vmem:[#allocation3 + $0x8] sm:$0xf] }
 0x161   : > { %v3076_v40 = vcombine.low %v2162_v10, %v2166_v35  ;;  %v3077_v11 = vcombine.low %v2170_v63, %v2174_v48  ;;  %v2478_v34 = vld [vmem:[#allocation3 + $0x10] sm:$0xf]  ;;  %v2493_v31 = vshrl.u32 %v2476_v42, 16  ;;  %v2496_v59 = vshll.u32 %v2476_v42, 16 }
 0x162   : > { %3325 = vmatpush3.bf16.msra.mxu0 %v3532_v22  ;;  %v2507_v35 = vshrl.u32 %v2478_v34, 16  ;;  %v2510_v41 = vshll.u32 %v2478_v34, 16  ;;  %v2521_v63 = vshrl.u32 %v2480_v18, 16  ;;  %v2535_v10 = vshrl.u32 %v2482_v7, 16  ;;  %v2486_v16 = vld [vmem:[#allocation3 + $0x30] sm:$0xf] }
 0x163   : > { %3334 = vmatprep.subr.bf16.mxu0 %v4243_v56  ;;  %v2495_v48 = vrot.slane %v2493_v31, 4  ;;  %v2498_v4 = vrot.slane %v2496_v59, 5  ;;  %v2526_v36 = vrot.slane %v2524_v46, 5  ;;  %v2563_v34 = vshrl.u32 %v2486_v16, 16 }
 0x164   : > { %v2512_v49 = vrot.slane %v2510_v41, 5  ;;  %v2523_v44 = vrot.slane %v2521_v63, 4  ;;  %v2537_v2 = vrot.slane %v2535_v10, 4  ;;  %v2566_v31 = vshll.u32 %v2486_v16, 16 }
 0x165   : > { %3303 = vmatmul.mubr.msk.bf16.vlgmr.msra.gmra.mrb[4].mxu1 %vm852_vm14, %v3054_v60  ;;  %v2441_v60 = vsel %vm4247_vm1, 0, %v2440_v32  ;;  %v2499_v57 = vor.u32 %v2498_v4, %v2495_v48  ;;  %v4282_v32 = vld [vmem:[%s4419_s4] ss:$0 sm:$0xff]  ;;  %v2483_v46 = vld [vmem:[#allocation3 + $0x24] sm:$0x1] }
 0x166   : > { %3311 = vmatpush3.bf16.msra.mxu1 %v4160_v52  ;;  %3306 = vmatprep.mubr.msk.bf16.mxu1 %vm852_vm14, %v3055_v58  ;;  %v3056_v52 = vcombine.low %v1998_v3, %v2012_v28  ;;  %2442 = vst [vmem:[#allocation3 + $0x4] sm:$0x1] %v2441_v60  ;;  %v2449_v58 = vld [vmem:[#allocation3 + $0x1c] sm:$0x1]  ;;  %v2438_v3 = vsel %vm4247_vm1, 0, %v2437_v9  ;;  %v2462_v28 = vsel %vm4247_vm1, 0, %v2461_v27  ;;  %v2527_v0 = vor.u32 %v2526_v36, %v2523_v44 }
 0x167   : > { %3312 = vmatprep.subr.bf16.mxu1 %v3530_v61  ;;  %v2450_v62 = vsel %vm4247_vm1, 0, %v2449_v58  ;;  %2439 = vst [vmem:[#allocation3 + $0x44] sm:$0x1] %v2438_v3  ;;  %2463 = vst [vmem:[#allocation3 + $0x3c] sm:$0x1] %v2462_v28  ;;  %v4285_v9 = vrot.slane %v2499_v57, 4 }
 0x168   : > { %2451 = vst [vmem:[#allocation3 + $0x1c] sm:$0x1] %v2450_v62 }
 0x16a   : > { %3313 = vmatpush3.bf16.msra.mxu1 %v3530_v61  ;;  %v2447_v61 = vsel %vm4247_vm1, 0, %v2446_v1 }
 0x16b   : > { %2448 = vst [vmem:[#allocation3 + $0x14] sm:$0x1] %v2447_v61 }
 0x16d   : > { %3307 = vmatmul.mubr.msk.bf16.gmra.mrb[0].mxu1 %vm852_vm14, %v3056_v52 }
 0x16e   : > { %3314 = vmatprep.mubr.msk.bf16.mxu1 %vm852_vm14, %v3075_v53  ;;  %v2464_v17 = vld [vmem:[#allocation3 + $0x44] sm:$0x1] }
 0x16f   : > { %v2465_v8 = vsel %vm4247_vm1, 0, %v2464_v17  ;;  %v2481_v17 = vld [vmem:[#allocation3 + $0x1c] sm:$0x1] }
 0x170   : > { %2466 = vst [vmem:[#allocation3 + $0x44] sm:$0x1] %v2465_v8  ;;  %v2549_v8 = vshrl.u32 %v2484_v43, 16 }
 0x172   : > { %v2479_v14 = vld [vmem:[#allocation3 + $0x14] sm:$0x1]  ;;  %v2551_v4 = vrot.slane %v2549_v8, 4 }
 0x173   : > { %v2516_v27 = vshll.u32 %v2479_v14, 16 }
 0x175   : > { %3315 = vmatmul.mubr.msk.bf16.vlgmr.msra.gmra.mrb[4].mxu1 %vm852_vm14, %v3076_v40  ;;  %v2538_v40 = vshll.u32 %v2482_v7, 16  ;;  %v4290_v7 = vrot.slane %v2527_v0, 4  ;;  %v2518_v63 = vrot.slane %v2516_v27, 5  ;;  %v2487_v0 = vld [vmem:[#allocation3 + $0x34] sm:$0x1] }
 0x176   : > { %3318 = vmatprep.mubr.msk.bf16.mxu1 %vm852_vm14, %v3077_v11  ;;  %v2509_v11 = vrot.slane %v2507_v35, 4 }
 0x177   : > { %v2540_v50 = vrot.slane %v2538_v40, 5 }
 0x178   : > { %v2513_v60 = vor.u32 %v2512_v49, %v2509_v11 }
 0x179   : > { %v2541_v5 = vor.u32 %v2540_v50, %v2537_v2  ;;  %v2565_v2 = vrot.slane %v2563_v34, 4  ;;  %v2568_v50 = vrot.slane %v2566_v31, 5 }
 0x17a   : > { %v2514_v42 = vrot.slane %v2513_v60, 4  ;;  %v2544_v60 = vshll.u32 %v2483_v46, 16 }
 0x17b   : > { %v2569_v27 = vor.u32 %v2568_v50, %v2565_v2 }
 0x17c   : > { %v2546_v34 = vrot.slane %v2544_v60, 5 }
 0x17d   : > { %3319 = vmatmul.mubr.msk.bf16.gmra.mrb[0].mxu1 %vm852_vm14, %v3078_v37  ;;  %v2477_v37 = vld [vmem:[#allocation3 + $0xc] sm:$0x1]  ;;  %v2570_v46 = vrot.slane %v2569_v27, 4 }
 0x17e   : > { %v2502_v62 = vshll.u32 %v2477_v37, 16  ;;  %v2488_v37 = vld [vmem:[#allocation3 + $0x38] sm:$0xf] }
 0x180   : > { %v2504_v18 = vrot.slane %v2502_v62, 5  ;;  %v2519_v62 = vsel %vm3917_vm13, %v2514_v42, %v2518_v63 }
 0x20a   : > { %v4271_v45 = vpop.f32.mrb[12].mxu0 }
 0x20b   : > { %v4273_v52 = vpop.f32.mrb[13].mxu0 }
 0x20c   : > { %v4275_v47 = vpop.f32.mrb[14].mxu0 }
 0x20d   : > { %v4277_v33 = vpop.f32.mrb[15].mxu0 }
 0x212   : > { %v3244_v53 = vpop.f32.mrb[8].mxu0 }
 0x213   : > { %v1173_v38 = vpop.f32.mrb[9].mxu0 }
 0x214   : > { %v3245_v39 = vpop.f32.mrb[10].mxu0 }
 0x215   : > { %v1176_v23 = vpop.f32.mrb[11].mxu0 }
 0x248   : > { %v3316_v22 = vpop.f32.mrb[4].mxu1 }
 0x249   : > { %v3358_v54 = vadd.f32 %v3316_v22, %v3244_v53  ;;  %v2258_v1 = vpop.f32.mrb[5].mxu1  ;;  %v2552_v53 = vshll.u32 %v2484_v43, 16  ;;  %v2485_v43 = vld [vmem:[#allocation3 + $0x2c] sm:$0x1] }
 0x24a   : > { %v3359_v61 = vadd.f32 %v2258_v1, %v1173_v38  ;;  %v3317_v58 = vpop.f32.mrb[6].mxu1  ;;  %v3534_v1 = vld [vmem:[%s4422_s7] sm:$0xff]  }
 0x24b   : > { %v2306_v20 = vadd.f32 %v3358_v54, %v4282_v32  ;;  %v3360_v6 = vadd.f32 %v3317_v58, %v3245_v39  ;;  %v2261_v51 = vpop.f32.mrb[7].mxu1  ;;  %v4292_v39 = vrot.slane %v2541_v5, 4  ;;  %v2554_v11 = vrot.slane %v2552_v53, 5  ;;  %v2490_v5 = vld [vmem:[#allocation3 + $0x40] sm:$0xf] }
 0x24c   : > { %v2304_v3 = vadd.f32 %v3359_v61, %v4282_v32  ;;  %v3361_v28 = vadd.f32 %v2261_v51, %v1176_v23  ;;  %v2530_v23 = vshll.u32 %v2481_v17, 16  ;;  %v2505_v54 = vsel %vm3917_vm13, %v4285_v9, %v2504_v18 }
 0x24d   : > { %v2307_v38 = vadd.f32 %v3360_v6, %v4282_v32  ;;  %v2314_v35 = vmax.f32 %v2306_v20, 0.0  ;;  %v2555_v6 = vor.u32 %v2554_v11, %v2551_v4  ;;  %v2577_v51 = vshrl.u32 %v2488_v37, 16  ;;  %v2491_v4 = vld [vmem:[#allocation3 + $0x44] sm:$0x1] }
 0x24e   : > { %v2305_v59 = vadd.f32 %v3361_v28, %v4282_v32  ;;  %v2312_v10 = vmax.f32 %v2304_v3, 0.0  ;;  %v2580_v3 = vshll.u32 %v2488_v37, 16  ;;  %v2572_v17 = vshll.u32 %v2487_v0, 16 }
 0x24f   : > { %v2315_v41 = vmax.f32 %v2307_v38, 0.0  ;;  %v2591_v8 = vshrl.u32 %v2490_v5, 16  ;;  %v2594_v53 = vshll.u32 %v2490_v5, 16  ;;  %v3095_v42 = vcombine.low %v2505_v54, %v2519_v62 }
 0x250   : > { %v2313_v40 = vmax.f32 %v2305_v59, 0.0  ;;  %v3320_v48 = vpop.f32.mrb[0].mxu1  ;;  %v2556_v18 = vrot.slane %v2555_v6, 4 }
 0x251   : > { %v2321_v49 = vpack.c.bf16 %v2315_v41, %v2314_v35  ;;  %v3362_v44 = vadd.f32 %v3320_v48, %v4271_v45  ;;  %v2274_v36 = vpop.f32.mrb[1].mxu1  ;;  %v2579_v35 = vrot.slane %v2577_v51, 4  ;;  %v2489_v48 = vld [vmem:[#allocation3 + $0x3c] sm:$0x1] }
 0x252   : > { %v2320_v57 = vpack.c.bf16 %v2313_v40, %v2312_v10  ;;  %v3363_v22 = vadd.f32 %v2274_v36, %v4273_v52  ;;  %v3321_v14 = vpop.f32.mrb[2].mxu1  ;;  %v2532_v52 = vrot.slane %v2530_v23, 5  ;;  %v2582_v23 = vrot.slane %v2580_v3, 5 }
 0x253   : > { %v2310_v45 = vadd.f32 %v3362_v44, %v4282_v32  ;;  %v3364_v61 = vadd.f32 %v3321_v14, %v4275_v47  ;;  %v2277_v58 = vpop.f32.mrb[3].mxu1  ;;  %v2558_v47 = vshll.u32 %v2485_v43, 16  ;;  %v2593_v40 = vrot.slane %v2591_v8, 4 }
 0x254   : > { %v2308_v16 = vadd.f32 %v3363_v22, %v4282_v32  ;;  %v3365_v20 = vadd.f32 %v2277_v58, %v4277_v33  ;;  %3326 = vmatprep.mubr.msk.bf16.mxu0 %vm852_vm14, %v2320_v57  ;;  %v2533_v11 = vsel %vm3917_vm13, %v4290_v7, %v2532_v52  ;;  %v2583_v36 = vor.u32 %v2582_v23, %v2579_v35 }
 0x255   : > { %v2311_v9 = vadd.f32 %v3364_v61, %v4282_v32  ;;  %3327 = vmatmul.mubr.msk.bf16.vlgmr.msra.gmra.mrb[16].mxu0 %vm852_vm14, %v2321_v49  ;;  %v2318_v38 = vmax.f32 %v2310_v45, 0.0  ;;  %v2560_v63 = vrot.slane %v2558_v47, 5  ;;  %v2547_v49 = vsel %vm3917_vm13, %v4292_v39, %v2546_v34 }
 0x256   : > { %v2309_v28 = vadd.f32 %v3365_v20, %v4282_v32  ;;  %3335 = vmatpush3.bf16.msra.mxu0 %v4243_v56  ;;  %v2316_v31 = vmax.f32 %v2308_v16, 0.0  ;;  %v2574_v32 = vrot.slane %v2572_v17, 5  ;;  %v2596_v56 = vrot.slane %v2594_v53, 5 }
 0x257   : > { %v2319_v33 = vmax.f32 %v2311_v9, 0.0  ;;  %3344 = vmatprep.subr.bf16.mxu0 %v3534_v1  ;;  %v2561_v44 = vsel %vm3917_vm13, %v2556_v18, %v2560_v63  ;;  %v2586_v50 = vshll.u32 %v2489_v48, 16  ;;  %v2600_v57 = vshll.u32 %v2491_v4, 16 }
 0x258   : > { %v2317_v59 = vmax.f32 %v2309_v28, 0.0  ;;  %v2575_v2 = vsel %vm3917_vm13, %v2570_v46, %v2574_v32  ;;  %v2597_v37 = vor.u32 %v2596_v56, %v2593_v40  ;;  %v3096_v22 = vcombine.low %v2533_v11, %v2547_v49 }
 0x259   : > { %v2323_v41 = vpack.c.bf16 %v2319_v33, %v2318_v38  ;;  %v3097_v14 = vcombine.low %v2561_v44, %v2575_v2  ;;  %v2584_v54 = vrot.slane %v2583_v36, 4  ;;  %v2588_v7 = vrot.slane %v2586_v50, 5 }
 0x25a   : > { %v2322_v10 = vpack.c.bf16 %v2317_v59, %v2316_v31  ;;  %v2598_v60 = vrot.slane %v2597_v37, 4  ;;  %v2602_v43 = vrot.slane %v2600_v57, 5  ;;  %v3106_v58 = vcombine.low %v3734_v21, %v3743_v25 }
 0x25b   : > { %v2589_v39 = vsel %vm3917_vm13, %v2584_v54, %v2588_v7 }
 0x25c   : > { %3330 = vmatprep.mubr.msk.bf16.mxu0 %vm852_vm14, %v2322_v10  ;;  %v2603_v45 = vsel %vm3917_vm13, %v2598_v60, %v2602_v43 }
 0x25d   : > { %3331 = vmatmul.mubr.msk.bf16.gmra.mrb[20].mxu0 %vm852_vm14, %v2323_v41  ;;  %v3098_v61 = vcombine.low %v2589_v39, %v2603_v45 }
 0x25e   : > { %3336 = vmatprep.mubr.msk.bf16.mxu0 %vm447_vm7, %v3095_v42 }
 0x265   : > { %3337 = vmatmul.mubr.msk.bf16.vlgmr.msra.gmra.mrb[16].mxu0 %vm447_vm7, %v3096_v22 }
 0x266   : > { %3345 = vmatpush3.bf16.msra.mxu0 %v3534_v1  ;;  %3340 = vmatprep.mubr.msk.bf16.mxu0 %vm447_vm7, %v3097_v14 }
 0x26d   : > { %3341 = vmatmul.mubr.msk.bf16.gmra.mrb[20].mxu0 %vm447_vm7, %v3098_v61 }
 0x26e   : > { %3346 = vmatprep.mubr.msk.bf16.mxu0 %vm447_vm7, %v3104_v24 }
 0x275   : > { %3347 = vmatmul.mubr.msk.bf16.vlgmr.msra.gmra.mrb[16].mxu0 %vm447_vm7, %v3105_v29 }
 0x276   : > { %3350 = vmatprep.mubr.msk.bf16.mxu0 %vm447_vm7, %v3106_v58 }
 0x27d   : > { %3351 = vmatmul.mubr.msk.bf16.gmra.mrb[20].mxu0 %vm447_vm7, %v3107_v55 }
 0x348   : > { %v3348_v13 = vpop.f32.mrb[16].mxu0 }
 0x349   : > { %v3366_v19 = vadd.f32 %v3348_v13, %v3086_v12  ;;  %v2776_v21 = vpop.f32.mrb[17].mxu0 }
 0x34a   : > { %v3368_v24 = vadd.f32 %v3086_v12, %v2776_v21  ;;  %v3349_v25 = vpop.f32.mrb[18].mxu0 }
 0x34b   : > { %v3367_v29 = vadd.f32 %v3366_v19, %v3113_v15  ;;  %v3370_v26 = vadd.f32 %v3349_v25, %v3086_v12  ;;  %v2779_v30 = vpop.f32.mrb[19].mxu0 }
 0x34c   : > { %v3369_v1 = vadd.f32 %v3368_v24, %v3113_v15  ;;  %v3372_v62 = vadd.f32 %v3086_v12, %v2779_v30 }
 0x34d   : > { %2832 = vst.msk [vmem:[%s325_s22 + $0x10] sm:$0xff] %vm852_vm14, %v3367_v29  ;;  %v3371_v52 = vadd.f32 %v3370_v26, %v3113_v15 }
 0x34e   : > { %2830 = vst.msk [vmem:[%s325_s22] sm:$0xff] %vm852_vm14, %v3369_v1  ;;  %v3373_v0 = vadd.f32 %v3372_v62, %v3113_v15 }
 0x34f   : > { %2833 = vst.msk [vmem:[%s325_s22 + $0x18] sm:$0xff] %vm852_vm14, %v3371_v52 }
 0x350   : > { %2831 = vst.msk [vmem:[%s325_s22 + $0x8] sm:$0xff] %vm852_vm14, %v3373_v0  ;;  %v3352_v5 = vpop.f32.mrb[20].mxu0 }
 0x351   : > { %v3374_v16 = vadd.f32 %v3352_v5, %v3086_v12  ;;  %v2792_v20 = vpop.f32.mrb[21].mxu0 }
 0x352   : > { %v3376_v6 = vadd.f32 %v3086_v12, %v2792_v20  ;;  %v3353_v51 = vpop.f32.mrb[22].mxu0 }
 0x353   : > { %v3375_v9 = vadd.f32 %v3374_v16, %v3113_v15  ;;  %v3378_v47 = vadd.f32 %v3353_v51, %v3086_v12  ;;  %v2795_v27 = vpop.f32.mrb[23].mxu0 }
 0x354   : > { %v3377_v3 = vadd.f32 %v3376_v6, %v3113_v15  ;;  %v3380_v28 = vadd.f32 %v3086_v12, %v2795_v27 }
 0x355   : > { %2836 = vst.msk [vmem:[%s325_s22 + $0x30] sm:$0xff] %vm852_vm14, %v3375_v9  ;;  %v3379_v17 = vadd.f32 %v3378_v47, %v3113_v15 }
 0x356   : > { %2834 = vst.msk [vmem:[%s325_s22 + $0x20] sm:$0xff] %vm852_vm14, %v3377_v3  ;;  %v3381_v8 = vadd.f32 %v3380_v28, %v3113_v15 }
 0x357   : > { %2837 = vst.msk [vmem:[%s325_s22 + $0x38] sm:$0xff] %vm852_vm14, %v3379_v17 }
 0x358   : > { %2835 = vst.msk [vmem:[%s325_s22 + $0x28] sm:$0xff] %vm852_vm14, %v3381_v8 }
 0x359   : > { %3548 = shalt.err (!%p3545_p3)
}
 0x35a   : > { %s3549_s28 = scalar_lea.hbm %s4365_s27, 1024  ;;  %s3553_s23 = scalar_lea.hbm %s4424_s9, 2048 }
 0x35b   : > { %p3550_p4 = scmp.ne.s32.totalorder %s4365_s27, %s3549_s28  ;;  %p3554_p9 = scmp.lt.u32.totalorder %s4365_s27, %s4424_s9 }
 0x35c   : > { %p3555_p10 = scmp.lt.u32.totalorder %s3553_s23, %s3549_s28  ;;  %p3557_p12 = scmp.lt.u32.totalorder %s3549_s28, %s4365_s27 }
 0x35d   : > { %p3551_p7 = pnand %p3550_p4, %p3691_p5 }
 0x35e   : > { %p3556_p11 = por %p3555_p10, %p3554_p9 }
 0x35f   : > { %p3552_p8 = pneg %p3551_p7 }
 0x360   : > { %p3558_p13 = por %p3557_p12, %p3556_p11 }
 0x362   : > { %p3559_p0 = pnand %p3558_p13, %p3552_p8 }
 0x364   : > { %3562 = shalt.err (!%p3559_p0)
}
 0x365   : > { %s3601_s29 = smov 128   ;;  %s3602_s14 = smov 8  }
 0x366   : > { %3454 = dma.vmem_to_hbm [thread:$0]  (%p3691_p5), %s4367_s24, 1024, %s4365_s27, %s4374_s13, %s3601_s29, %s3601_s29, %s3602_s14  }
 0x367 PF: > { %p3460_p1 = scmp.ge.s32.totalorder %s3597_s12, 2  ;;  %s2867_s16 = sand.u32 1, %s3585_s30  }
 0x368   : > { %s2868_s17 = scalar_lea.sflag [#allocation5], %s2867_s16 }
 0x369   : > { %p3457_p2 = pnand %p3460_p1, %p3695_p6 }
 0x36b   : > { %3580 = dma.done.wait (!%p3457_p2), %s2868_s17, 1024  }
 0x36c   : > { %3582 = vsyncadd (!%p3457_p2), %s2868_s17, 4294966272  ;;  %p19_p3 = scmp.ge.s32.totalorder %s3678_s15, 4   ;;  %s4439_s30 = smov %s3589_s10 }
 0x36d   : > { %s4440_s10 = smov %s3593_s11  ;;  %s4441_s11 = smov %s3689_s18 }
 0x36e   : > { %s4442_s12 = smov %s3678_s15  ;;  %21 = sbr.rel (!%p19_p3) target bundleno = 3 (0x3), region = 105 }
 0x375   :  { %2873 = vsyncpa [#allocation5], 1 }
 0x376   :  { %2875 = vsyncpa [#allocation5 + $0x1], 1 }

</bundles_post_ra>
